<compile_context>
chip_gen: v7x
topology: tpu7x:2x2x1
jax: 0.10.0
libtpu: 0.0.40
codegen_flags: <defaults>
</compile_context>

<pallas_src>
import math

import numpy as np
import jax
import jax.numpy as jnp
from jax.experimental import pallas as pl
from jax.experimental.pallas import tpu as pltpu


# ------------------------------ configuration ------------------------------
PE_LEVELS_POS = 4                        # cfg_background.encoding.levels
PE_LEVELS_VIEW = 2                       # cfg_background.encoding_view.levels
POS_ENC_DIM = 8 * PE_LEVELS_POS          # 32
VIEW_ENC_DIM = 6 * PE_LEVELS_VIEW        # 12
APP_DIM = 8                              # appear_embed.dim (enabled)
HIDDEN = 64                              # mlp.hidden_dim == mlp.hidden_dim_rgb
FEAT_IN = 4 + POS_ENC_DIM                # 36
RGB_IN = HIDDEN + 2 * VIEW_ENC_DIM + APP_DIM   # 96

PACK_ROWS = 24    # packed input rows: [pts,1 | rays,0 | light,0 | pad*4 | app*8]
ENC_ROWS = 64     # fused sin rows: 32 pos + 16 view (padded) + 16 light (padded)
OUT_ROWS = 4      # [rgb(3) | density(1)]
TILE_N = 1024     # lanes (samples) per grid step; sweep 512/1024/2048 for huge N


# --------------------------------- kernel -----------------------------------
def _lumen_bg_kernel(x_ref, freq_ref, phase_ref,
                     w0e_ref, w0p_ref, b0_ref,
                     w1_ref, b1_ref, w2_ref, b2_ref,
                     w3_ref, b3_ref,
                     v0f_ref, v0e_ref, v0a_ref, c0_ref,
                     v1_ref, c1_ref,
                     out_ref):
    f32 = jnp.float32

    def mm(w_ref, act):
        # bf16 MXU matmul (weights pre-cast in the wrapper), fp32 accumulation.
        # Feature-major orientation: LHS = small weight, RHS N = tile lanes.
        return jnp.dot(w_ref[...], act.astype(jnp.bfloat16),
                       preferred_element_type=f32)

    x = x_ref[...]                                   # (24, tn) fp32

    # ---- encode(points_3D): inverted-sphere 4-vector -----------------------
    # x rows: [px,py,pz,1 | rx,ry,rz,0 | lx,ly,lz,0 | 0*4 | app*8]
    ss = (x[0:1, :] * x[0:1, :] + x[1:2, :] * x[1:2, :] + x[2:3, :] * x[2:3, :])
    inv = jax.lax.rsqrt(ss)                          # (1, tn) = 1/|pts|
    points4 = x[0:4, :] * inv                        # [pts/|p|, 1/|p|]  (4, tn)
    rays4 = x[4:8, :]                                # [rays, 0]         (4, tn)
    light4 = x[8:12, :]                              # [light, 0]        (4, tn)
    app = x[16:24, :]                                # (8, tn)

    # ---- single fused Fourier encoding: ONE sin over a (64, tn) tile --------
    # rows  0..31 : pos  enc, level-major blocks [sin l | cos l], dims 0..3
    # rows 32..47 : view enc (dim 3 padded to 4; pad rows have freq = phase = 0)
    # rows 48..63 : light enc (same structure)
    # cos(x) = sin(x + pi/2) is folded into the constant phase column.
    rep = jnp.concatenate([points4] * (2 * PE_LEVELS_POS)
                          + [rays4] * (2 * PE_LEVELS_VIEW)
                          + [light4] * (2 * PE_LEVELS_VIEW), axis=0)    # (64, tn)
    enc = jnp.sin(rep * freq_ref[...] + phase_ref[...])                 # (64, tn)

    # ---- mlp_feat: [36, 64, 64, 64, 65], ReLU; partial matmuls (no concats) -
    h = jnp.maximum(mm(w0e_ref, enc[0:POS_ENC_DIM, :]) + mm(w0p_ref, points4)
                    + b0_ref[...], 0.0)
    h = jnp.maximum(mm(w1_ref, h) + b1_ref[...], 0.0)
    h = jnp.maximum(mm(w2_ref, h) + b2_ref[...], 0.0)
    head = mm(w3_ref, h) + b3_ref[...]               # (65, tn): 0..63 feat, 64 dens
    feat = jnp.maximum(head[0:HIDDEN, :], 0.0)       # (64, tn)
    dens_pre = head[HIDDEN:HIDDEN + 1, :]            # (1, tn)

    # ---- view-dependent rgb branch (x_rgb built by summing partial matmuls) -
    g = jnp.maximum(mm(v0f_ref, feat) + mm(v0e_ref, enc[POS_ENC_DIM:, :])
                    + mm(v0a_ref, app) + c0_ref[...], 0.0)
    rgb_pre = mm(v1_ref, g) + c1_ref[...]            # (3, tn)

    # ---- fused sigmoid(rgb) / softplus(density): one shared exp(-|x|) -------
    pre = jnp.concatenate([rgb_pre, dens_pre], axis=0)          # (4, tn)
    e = jnp.exp(-jnp.abs(pre))
    sig = jnp.where(pre >= 0.0, 1.0, e) / (1.0 + e)             # sigmoid(pre)
    sp = jnp.maximum(pre, 0.0) + jnp.log(1.0 + e)               # softplus(pre)
    row = jax.lax.broadcasted_iota(jnp.int32, (OUT_ROWS, 1), 0)
    out_ref[...] = jnp.where(row < 3, sig, sp)                  # lane-dense store


# ------------------------------ pallas wrapper -------------------------------
def _lumen_bg_pallas(x, kparams, tile_n):
    n_pad = x.shape[1]
    grid = (n_pad // tile_n,)
    col_map = lambda i: (0, i)
    fix_map = lambda i: (0, 0)        # weights: one full block, fetched once
                                      # (Pallas elides re-copies of unchanged blocks)

    in_specs = [pl.BlockSpec((PACK_ROWS, tile_n), col_map)]
    in_specs += [pl.BlockSpec(w.shape, fix_map) for w in kparams]

    macs = (HIDDEN * POS_ENC_DIM + HIDDEN * 4 + 2 * HIDDEN * HIDDEN
            + (HIDDEN + 1) * HIDDEN + HIDDEN * HIDDEN + HIDDEN * 32
            + HIDDEN * APP_DIM + 3 * HIDDEN)
    weight_bytes = sum(int(np.prod(w.shape)) * w.dtype.itemsize for w in kparams)
    cost = pl.CostEstimate(
        flops=2 * macs * n_pad,
        transcendentals=(ENC_ROWS + 2 * OUT_ROWS + 1) * n_pad,
        bytes_accessed=n_pad * 4 * (PACK_ROWS + OUT_ROWS) + weight_bytes,
    )

    return pl.pallas_call(
        _lumen_bg_kernel,
        out_shape=jax.ShapeDtypeStruct((OUT_ROWS, n_pad), jnp.float32),
        grid_spec=pltpu.PrefetchScalarGridSpec(
            num_scalar_prefetch=0,
            grid=grid,
            in_specs=in_specs,
            out_specs=pl.BlockSpec((OUT_ROWS, tile_n), col_map),
        ),
        compiler_params=pltpu.CompilerParams(
            dimension_semantics=("parallel",),
            vmem_limit_bytes=16 * 1024 * 1024,
        ),
        cost_estimate=cost,
    )(x, *kparams)


# ------------------------- parameter layout plumbing -------------------------
def _enc_perm(dim, levels, pad_dim):
    """kernel enc row (level, trig, padded-dim) -> canonical Fourier column
    (dim, trig, level); -1 marks kernel pad rows."""
    perm = []
    for l in range(levels):
        for t in range(2):
            for d in range(pad_dim):
                perm.append(d * 2 * levels + t * levels + l if d < dim else -1)
    return perm


def _fourier_freq_phase():
    """(64,1) frequency / phase columns for the fused sin (cos = sin(x+pi/2))."""
    freq = np.zeros((ENC_ROWS, 1), np.float32)
    phase = np.zeros((ENC_ROWS, 1), np.float32)

    def fill(base, levels, dim, pad_dim):
        for l in range(levels):
            for t in range(2):
                for d in range(pad_dim):
                    k = base + (2 * l + t) * pad_dim + d
                    if d < dim:
                        freq[k, 0] = (2.0 ** l) * math.pi
                        phase[k, 0] = t * (math.pi / 2.0)

    fill(0, PE_LEVELS_POS, 4, 4)
    fill(32, PE_LEVELS_VIEW, 3, 4)
    fill(48, PE_LEVELS_VIEW, 3, 4)
    return freq, phase


def _prepare_kernel_params(params):
    """Permute / transpose / split canonical parameters into the feature-major
    kernel layout (bf16 matmul weights, fp32 (C,1) bias columns)."""
    w0, b0, w1, b1, w2, b2, w3, b3, v0, c0, v1, c1 = params
    bf = lambda a: a.astype(jnp.bfloat16)
    col = lambda b: b.reshape(-1, 1).astype(jnp.float32)

    # layer 0 split: Fourier-encoding part (kernel row order) + raw points4 part
    pp = np.asarray(_enc_perm(4, PE_LEVELS_POS, 4), np.int32)        # 32, no pads
    w0e = bf(w0[4 + pp, :].T)                                         # (64, 32)
    w0p = bf(w0[0:4, :].T)                                            # (64, 4)

    # merged head: kernel rows 0..63 = feature (canon cols 1:), row 64 = density
    w3t = bf(jnp.concatenate([w3[:, 1:].T, w3[:, 0:1].T], axis=0))    # (65, 64)
    b3t = jnp.concatenate([b3[0, 1:], b3[0, 0:1]]).reshape(-1, 1).astype(jnp.float32)

    # rgb layer 0 partials: feat / padded (view+light) encoding / appearance
    v0f = bf(v0[0:HIDDEN, :].T)                                       # (64, 64)
    v0a = bf(v0[HIDDEN + 2 * VIEW_ENC_DIM:, :].T)                     # (64, 8)
    pv = _enc_perm(3, PE_LEVELS_VIEW, 4)                              # 16 (with pads)
    pv_idx = np.asarray([c if c >= 0 else 0 for c in pv], np.int32)
    pv_msk = np.asarray([[1.0 if c >= 0 else 0.0] for c in pv], np.float32)
    view_rows = v0[HIDDEN + pv_idx, :] * pv_msk                       # (16, 64)
    light_rows = v0[HIDDEN + VIEW_ENC_DIM + pv_idx, :] * pv_msk       # (16, 64)
    v0e = bf(jnp.concatenate([view_rows, light_rows], axis=0).T)      # (64, 32)

    freq, phase = _fourier_freq_phase()

    return (jnp.asarray(freq), jnp.asarray(phase),
            w0e, w0p, col(b0),
            bf(w1.T), col(b1), bf(w2.T), col(b2),
            w3t, b3t,
            v0f, v0e, v0a, col(c0),
            bf(v1.T), col(c1))


# ------------------------------ forward wrapper ------------------------------
def _round_up(x, m):
    return (x + m - 1) // m * m


def _choose_tile(n, cap):
    if n <= 128:
        return 128
    # ensure >= 2 grid steps whenever possible (v7x has 2 TensorCores)
    half = _round_up((n + 1) // 2, 128)
    return min(cap, half)


def lumen_background_forward(points_3D, rays_unit, pts_light, app_outside,
                             params, tile_n=TILE_N):
    """LumenBackgroundNeRF.forward (fourier encodings, view_dep=True) -> (rgb, density)."""
    lead = points_3D.shape[:-1]
    n = int(np.prod(lead)) if lead else 1
    pts = points_3D.reshape(n, 3).astype(jnp.float32)
    rays = rays_unit.reshape(n, 3).astype(jnp.float32)
    light = pts_light.reshape(n, 3).astype(jnp.float32)
    app = app_outside.reshape(n, APP_DIM).astype(jnp.float32)

    tn = _choose_tile(n, tile_n)
    n_pad = _round_up(n, tn)

    # single packed input stream (feature-major after the transpose)
    ones = jnp.ones((n, 1), jnp.float32)
    zeros1 = jnp.zeros((n, 1), jnp.float32)
    packed = jnp.concatenate(
        [pts, ones,                          # rows 0-3  : [pts, 1]
         rays, zeros1,                       # rows 4-7  : [rays, 0]
         light, zeros1,                      # rows 8-11 : [light, 0]
         jnp.zeros((n, 4), jnp.float32),     # rows 12-15: padding
         app],                               # rows 16-23: appearance embedding
        axis=-1)                             # (n, 24)
    if n_pad > n:
        fill = np.zeros((1, PACK_ROWS), np.float32)
        fill[0, 0] = 1.0                     # unit-norm padded point ...
        fill[0, 3] = 1.0                     # ... avoids rsqrt(0) in padded lanes
        packed = jnp.concatenate(
            [packed, jnp.broadcast_to(jnp.asarray(fill), (n_pad - n, PACK_ROWS))],
            axis=0)
    x = packed.T                             # (24, n_pad) feature-major slab

    kparams = _prepare_kernel_params(params)
    out = _lumen_bg_pallas(x, kparams, tn)   # (4, n_pad): [rgb | density]
    rgb = out[0:3, :n].T.reshape(*lead, 3)
    density = out[3, :n].reshape(lead)
    return rgb, density


# --------------------------- pure-JAX fp32 reference -------------------------
def positional_encoding_ref(x, levels):
    """nerf_util.positional_encoding (canonical (dim, sin/cos, level) layout)."""
    freqs = (2.0 ** jnp.arange(levels, dtype=jnp.float32)) * jnp.pi
    spectrum = x[..., None] * freqs                               # [..., D, L]
    enc = jnp.stack([jnp.sin(spectrum), jnp.cos(spectrum)], axis=-2)
    return enc.reshape(*x.shape[:-1], -1)                         # [..., 2*D*L]


def lumen_background_reference(points_3D, rays_unit, pts_light, app_outside,
                               params):
    w0, b0, w1, b1, w2, b2, w3, b3, v0, c0, v1, c1 = params
    relu = lambda x: jnp.maximum(x, 0.0)

    norm = jnp.linalg.norm(points_3D, axis=-1, keepdims=True)
    points = jnp.concatenate([points_3D / norm, 1.0 / norm], axis=-1)
    points_enc = jnp.concatenate(
        [points, positional_encoding_ref(points, PE_LEVELS_POS)], axis=-1)

    h = relu(points_enc @ w0 + b0)
    h = relu(h @ w1 + b1)
    h = relu(h @ w2 + b2)
    out = h @ w3 + b3
    density = jax.nn.softplus(out[..., 0])       # activ_density = softplus
    feat = relu(out[..., 1:])                    # mlp_feat.activ = ReLU

    view_enc = positional_encoding_ref(rays_unit, PE_LEVELS_VIEW)
    light_enc = positional_encoding_ref(pts_light, PE_LEVELS_VIEW)
    x = jnp.concatenate([feat, view_enc, light_enc, app_outside], axis=-1)
    g = relu(x @ v0 + c0)
    rgb = jax.nn.sigmoid(g @ v1 + c1)
    return rgb, density


def init_params(key):
    """Deterministic He-initialised parameters in the canonical (torch) layout."""
    def linear(k, fan_in, fan_out):
        kw, kb = jax.random.split(k)
        w = jax.random.normal(kw, (fan_in, fan_out), jnp.float32) * \
            jnp.sqrt(2.0 / fan_in)
        b = 0.05 * jax.random.normal(kb, (1, fan_out), jnp.float32)
        return w, b

    keys = jax.random.split(key, 6)
    w0, b0 = linear(keys[0], FEAT_IN, HIDDEN)
    w1, b1 = linear(keys[1], HIDDEN, HIDDEN)
    w2, b2 = linear(keys[2], HIDDEN, HIDDEN)
    w3, b3 = linear(keys[3], HIDDEN, HIDDEN + 1)     # [density | feat]
    v0, c0 = linear(keys[4], RGB_IN, HIDDEN)
    v1, c1 = linear(keys[5], HIDDEN, 3)
    return (w0, b0, w1, b1, w2, b2, w3, b3, v0, c0, v1, c1)


# ----------------------------------- main ------------------------------------
if __name__ == "__main__":
    key = jax.random.PRNGKey(0)
    kd, kr, kv, kl, ka, kw = jax.random.split(key, 6)

    B, R = 2, 128                                   # 256 background samples
    unit = lambda v: v / jnp.linalg.norm(v, axis=-1, keepdims=True)
    dirs = unit(jax.random.normal(kd, (B, R, 3), jnp.float32))
    radii = 1.5 + 3.0 * jax.random.uniform(kr, (B, R, 1), jnp.float32)
    points_3D = dirs * radii                        # background points, |p| > 1
    rays_unit = unit(jax.random.normal(kv, (B, R, 3), jnp.float32))
    pts_light = unit(jax.random.normal(kl, (B, R, 3), jnp.float32))
    app_outside = jax.random.normal(ka, (B, R, APP_DIM), jnp.float32)

    params = init_params(kw)

    fwd = jax.jit(lumen_background_forward)
    rgb, density = jax.block_until_ready(
        fwd(points_3D, rays_unit, pts_light, app_outside, params))
    assert rgb.shape == (B, R, 3) and density.shape == (B, R)

    rgb_ref, density_ref = lumen_background_reference(
        points_3D, rays_unit, pts_light, app_outside, params)
    rgb_err = float(jnp.max(jnp.abs(rgb - rgb_ref)))
    den_err = float(jnp.max(jnp.abs(density - density_ref)))
    # bf16 MXU inputs vs. the fp32 reference -> loose (but tight-enough) tolerance
    assert rgb_err < 3e-2 and den_err < 3e-2, (rgb_err, den_err)

    print("KERNEL_OK")
</pallas_src>

<mosaic_0001>
module attributes {stable_mosaic.version = 11 : i64} {
  func.func @_lumen_bg_kernel(%arg0: i32, %arg1: memref<24x128xf32, #tpu.memory_space<vmem>>, %arg2: memref<64x1xf32, #tpu.memory_space<vmem>>, %arg3: memref<64x1xf32, #tpu.memory_space<vmem>>, %arg4: memref<64x32xbf16, #tpu.memory_space<vmem>>, %arg5: memref<64x4xbf16, #tpu.memory_space<vmem>>, %arg6: memref<64x1xf32, #tpu.memory_space<vmem>>, %arg7: memref<64x64xbf16, #tpu.memory_space<vmem>>, %arg8: memref<64x1xf32, #tpu.memory_space<vmem>>, %arg9: memref<64x64xbf16, #tpu.memory_space<vmem>>, %arg10: memref<64x1xf32, #tpu.memory_space<vmem>>, %arg11: memref<65x64xbf16, #tpu.memory_space<vmem>>, %arg12: memref<65x1xf32, #tpu.memory_space<vmem>>, %arg13: memref<64x64xbf16, #tpu.memory_space<vmem>>, %arg14: memref<64x32xbf16, #tpu.memory_space<vmem>>, %arg15: memref<64x8xbf16, #tpu.memory_space<vmem>>, %arg16: memref<64x1xf32, #tpu.memory_space<vmem>>, %arg17: memref<3x64xbf16, #tpu.memory_space<vmem>>, %arg18: memref<3x1xf32, #tpu.memory_space<vmem>>, %arg19: memref<4x128xf32, #tpu.memory_space<vmem>>) attributes {dimension_semantics = [#tpu.dimension_semantics<parallel>], iteration_bounds = array<i64: 2>, scalar_prefetch = 0 : i64, scratch_operands = 0 : i64, tpu.core_type = #tpu.core_type<tc>, window_params = [{transform_indices = @transform_0, window_bounds = array<i64: 24, 128>}, {pipeline_mode = #tpu.pipeline_mode<synchronous>, transform_indices = @transform_1, window_bounds = array<i64: 64, 1>}, {pipeline_mode = #tpu.pipeline_mode<synchronous>, transform_indices = @transform_2, window_bounds = array<i64: 64, 1>}, {pipeline_mode = #tpu.pipeline_mode<synchronous>, transform_indices = @transform_3, window_bounds = array<i64: 64, 32>}, {pipeline_mode = #tpu.pipeline_mode<synchronous>, transform_indices = @transform_4, window_bounds = array<i64: 64, 4>}, {pipeline_mode = #tpu.pipeline_mode<synchronous>, transform_indices = @transform_5, window_bounds = array<i64: 64, 1>}, {pipeline_mode = #tpu.pipeline_mode<synchronous>, transform_indices = @transform_6, window_bounds = array<i64: 64, 64>}, {pipeline_mode = #tpu.pipeline_mode<synchronous>, transform_indices = @transform_7, window_bounds = array<i64: 64, 1>}, {pipeline_mode = #tpu.pipeline_mode<synchronous>, transform_indices = @transform_8, window_bounds = array<i64: 64, 64>}, {pipeline_mode = #tpu.pipeline_mode<synchronous>, transform_indices = @transform_9, window_bounds = array<i64: 64, 1>}, {pipeline_mode = #tpu.pipeline_mode<synchronous>, transform_indices = @transform_10, window_bounds = array<i64: 65, 64>}, {pipeline_mode = #tpu.pipeline_mode<synchronous>, transform_indices = @transform_11, window_bounds = array<i64: 65, 1>}, {pipeline_mode = #tpu.pipeline_mode<synchronous>, transform_indices = @transform_12, window_bounds = array<i64: 64, 64>}, {pipeline_mode = #tpu.pipeline_mode<synchronous>, transform_indices = @transform_13, window_bounds = array<i64: 64, 32>}, {pipeline_mode = #tpu.pipeline_mode<synchronous>, transform_indices = @transform_14, window_bounds = array<i64: 64, 8>}, {pipeline_mode = #tpu.pipeline_mode<synchronous>, transform_indices = @transform_15, window_bounds = array<i64: 64, 1>}, {pipeline_mode = #tpu.pipeline_mode<synchronous>, transform_indices = @transform_16, window_bounds = array<i64: 3, 64>}, {pipeline_mode = #tpu.pipeline_mode<synchronous>, transform_indices = @transform_17, window_bounds = array<i64: 3, 1>}, {transform_indices = @transform_18, window_bounds = array<i64: 4, 128>}]} {
    %c0 = arith.constant 0 : index
    %c0_0 = arith.constant 0 : index
    %0 = vector.load %arg1[%c0, %c0_0] : memref<24x128xf32, #tpu.memory_space<vmem>>, vector<24x128xf32>
    %1 = vector.extract_strided_slice %0 {offsets = [0, 0], sizes = [1, 128], strides = [1, 1]} : vector<24x128xf32> to vector<1x128xf32>
    %2 = vector.extract_strided_slice %0 {offsets = [0, 0], sizes = [1, 128], strides = [1, 1]} : vector<24x128xf32> to vector<1x128xf32>
    %3 = arith.mulf %1, %2 : vector<1x128xf32>
    %4 = vector.extract_strided_slice %0 {offsets = [1, 0], sizes = [1, 128], strides = [1, 1]} : vector<24x128xf32> to vector<1x128xf32>
    %5 = vector.extract_strided_slice %0 {offsets = [1, 0], sizes = [1, 128], strides = [1, 1]} : vector<24x128xf32> to vector<1x128xf32>
    %6 = arith.mulf %4, %5 : vector<1x128xf32>
    %7 = arith.addf %3, %6 : vector<1x128xf32>
    %8 = vector.extract_strided_slice %0 {offsets = [2, 0], sizes = [1, 128], strides = [1, 1]} : vector<24x128xf32> to vector<1x128xf32>
    %9 = vector.extract_strided_slice %0 {offsets = [2, 0], sizes = [1, 128], strides = [1, 1]} : vector<24x128xf32> to vector<1x128xf32>
    %10 = arith.mulf %8, %9 : vector<1x128xf32>
    %11 = arith.addf %7, %10 : vector<1x128xf32>
    %12 = math.rsqrt %11 : vector<1x128xf32>
    %13 = vector.extract_strided_slice %0 {offsets = [0, 0], sizes = [4, 128], strides = [1, 1]} : vector<24x128xf32> to vector<4x128xf32>
    %14 = vector.broadcast %12 : vector<1x128xf32> to vector<4x128xf32>
    %15 = arith.mulf %13, %14 : vector<4x128xf32>
    %16 = vector.extract_strided_slice %0 {offsets = [4, 0], sizes = [4, 128], strides = [1, 1]} : vector<24x128xf32> to vector<4x128xf32>
    %17 = vector.extract_strided_slice %0 {offsets = [8, 0], sizes = [4, 128], strides = [1, 1]} : vector<24x128xf32> to vector<4x128xf32>
    %18 = vector.extract_strided_slice %0 {offsets = [16, 0], sizes = [8, 128], strides = [1, 1]} : vector<24x128xf32> to vector<8x128xf32>
    %19 = tpu.concatenate %15, %15, %15, %15, %15, %15, %15, %15, %16, %16, %16, %16, %17, %17, %17, %17 in 0 : vector<4x128xf32>, vector<4x128xf32>, vector<4x128xf32>, vector<4x128xf32>, vector<4x128xf32>, vector<4x128xf32>, vector<4x128xf32>, vector<4x128xf32>, vector<4x128xf32>, vector<4x128xf32>, vector<4x128xf32>, vector<4x128xf32>, vector<4x128xf32>, vector<4x128xf32>, vector<4x128xf32>, vector<4x128xf32> -> vector<64x128xf32>
    %c0_1 = arith.constant 0 : index
    %c0_2 = arith.constant 0 : index
    %20 = vector.load %arg2[%c0_1, %c0_2] : memref<64x1xf32, #tpu.memory_space<vmem>>, vector<64x1xf32>
    %21 = vector.broadcast %20 : vector<64x1xf32> to vector<64x128xf32>
    %22 = arith.mulf %19, %21 : vector<64x128xf32>
    %c0_3 = arith.constant 0 : index
    %c0_4 = arith.constant 0 : index
    %23 = vector.load %arg3[%c0_3, %c0_4] : memref<64x1xf32, #tpu.memory_space<vmem>>, vector<64x1xf32>
    %24 = vector.broadcast %23 : vector<64x1xf32> to vector<64x128xf32>
    %25 = arith.addf %22, %24 : vector<64x128xf32>
    %26 = math.sin %25 : vector<64x128xf32>
    %27 = vector.extract_strided_slice %26 {offsets = [0, 0], sizes = [32, 128], strides = [1, 1]} : vector<64x128xf32> to vector<32x128xf32>
    %c0_5 = arith.constant 0 : index
    %c0_6 = arith.constant 0 : index
    %28 = vector.load %arg4[%c0_5, %c0_6] : memref<64x32xbf16, #tpu.memory_space<vmem>>, vector<64x32xbf16>
    %29 = arith.truncf %27 : vector<32x128xf32> to vector<32x128xbf16>
    %cst = arith.constant dense<0.000000e+00> : vector<64x128xf32>
    %30 = tpu.matmul %28, %29, %cst {dimension_numbers = #tpu.dot_dimension_numbers<[1], [0], [0], [1], [0, 0, 1, 1], [], []>} : vector<64x32xbf16>, vector<32x128xbf16>, vector<64x128xf32> -> vector<64x128xf32>
    %c0_7 = arith.constant 0 : index
    %c0_8 = arith.constant 0 : index
    %31 = vector.load %arg5[%c0_7, %c0_8] : memref<64x4xbf16, #tpu.memory_space<vmem>>, vector<64x4xbf16>
    %32 = arith.truncf %15 : vector<4x128xf32> to vector<4x128xbf16>
    %cst_9 = arith.constant dense<0.000000e+00> : vector<64x128xf32>
    %33 = tpu.matmul %31, %32, %cst_9 {dimension_numbers = #tpu.dot_dimension_numbers<[1], [0], [0], [1], [0, 0, 1, 1], [], []>} : vector<64x4xbf16>, vector<4x128xbf16>, vector<64x128xf32> -> vector<64x128xf32>
    %34 = arith.addf %30, %33 : vector<64x128xf32>
    %c0_10 = arith.constant 0 : index
    %c0_11 = arith.constant 0 : index
    %35 = vector.load %arg6[%c0_10, %c0_11] : memref<64x1xf32, #tpu.memory_space<vmem>>, vector<64x1xf32>
    %36 = vector.broadcast %35 : vector<64x1xf32> to vector<64x128xf32>
    %37 = arith.addf %34, %36 : vector<64x128xf32>
    %cst_12 = arith.constant 0.000000e+00 : f32
    %38 = vector.broadcast %cst_12 : f32 to vector<64x128xf32>
    %39 = arith.maximumf %37, %38 : vector<64x128xf32>
    %c0_13 = arith.constant 0 : index
    %c0_14 = arith.constant 0 : index
    %40 = vector.load %arg7[%c0_13, %c0_14] : memref<64x64xbf16, #tpu.memory_space<vmem>>, vector<64x64xbf16>
    %41 = arith.truncf %39 : vector<64x128xf32> to vector<64x128xbf16>
    %cst_15 = arith.constant dense<0.000000e+00> : vector<64x128xf32>
    %42 = tpu.matmul %40, %41, %cst_15 {dimension_numbers = #tpu.dot_dimension_numbers<[1], [0], [0], [1], [0, 0, 1, 1], [], []>} : vector<64x64xbf16>, vector<64x128xbf16>, vector<64x128xf32> -> vector<64x128xf32>
    %c0_16 = arith.constant 0 : index
    %c0_17 = arith.constant 0 : index
    %43 = vector.load %arg8[%c0_16, %c0_17] : memref<64x1xf32, #tpu.memory_space<vmem>>, vector<64x1xf32>
    %44 = vector.broadcast %43 : vector<64x1xf32> to vector<64x128xf32>
    %45 = arith.addf %42, %44 : vector<64x128xf32>
    %cst_18 = arith.constant 0.000000e+00 : f32
    %46 = vector.broadcast %cst_18 : f32 to vector<64x128xf32>
    %47 = arith.maximumf %45, %46 : vector<64x128xf32>
    %c0_19 = arith.constant 0 : index
    %c0_20 = arith.constant 0 : index
    %48 = vector.load %arg9[%c0_19, %c0_20] : memref<64x64xbf16, #tpu.memory_space<vmem>>, vector<64x64xbf16>
    %49 = arith.truncf %47 : vector<64x128xf32> to vector<64x128xbf16>
    %cst_21 = arith.constant dense<0.000000e+00> : vector<64x128xf32>
    %50 = tpu.matmul %48, %49, %cst_21 {dimension_numbers = #tpu.dot_dimension_numbers<[1], [0], [0], [1], [0, 0, 1, 1], [], []>} : vector<64x64xbf16>, vector<64x128xbf16>, vector<64x128xf32> -> vector<64x128xf32>
    %c0_22 = arith.constant 0 : index
    %c0_23 = arith.constant 0 : index
    %51 = vector.load %arg10[%c0_22, %c0_23] : memref<64x1xf32, #tpu.memory_space<vmem>>, vector<64x1xf32>
    %52 = vector.broadcast %51 : vector<64x1xf32> to vector<64x128xf32>
    %53 = arith.addf %50, %52 : vector<64x128xf32>
    %cst_24 = arith.constant 0.000000e+00 : f32
    %54 = vector.broadcast %cst_24 : f32 to vector<64x128xf32>
    %55 = arith.maximumf %53, %54 : vector<64x128xf32>
    %c0_25 = arith.constant 0 : index
    %c0_26 = arith.constant 0 : index
    %56 = vector.load %arg11[%c0_25, %c0_26] : memref<65x64xbf16, #tpu.memory_space<vmem>>, vector<65x64xbf16>
    %57 = arith.truncf %55 : vector<64x128xf32> to vector<64x128xbf16>
    %cst_27 = arith.constant dense<0.000000e+00> : vector<65x128xf32>
    %58 = tpu.matmul %56, %57, %cst_27 {dimension_numbers = #tpu.dot_dimension_numbers<[1], [0], [0], [1], [0, 0, 1, 1], [], []>} : vector<65x64xbf16>, vector<64x128xbf16>, vector<65x128xf32> -> vector<65x128xf32>
    %c0_28 = arith.constant 0 : index
    %c0_29 = arith.constant 0 : index
    %59 = vector.load %arg12[%c0_28, %c0_29] : memref<65x1xf32, #tpu.memory_space<vmem>>, vector<65x1xf32>
    %60 = vector.broadcast %59 : vector<65x1xf32> to vector<65x128xf32>
    %61 = arith.addf %58, %60 : vector<65x128xf32>
    %62 = vector.extract_strided_slice %61 {offsets = [0, 0], sizes = [64, 128], strides = [1, 1]} : vector<65x128xf32> to vector<64x128xf32>
    %cst_30 = arith.constant 0.000000e+00 : f32
    %63 = vector.broadcast %cst_30 : f32 to vector<64x128xf32>
    %64 = arith.maximumf %62, %63 : vector<64x128xf32>
    %65 = vector.extract_strided_slice %61 {offsets = [64, 0], sizes = [1, 128], strides = [1, 1]} : vector<65x128xf32> to vector<1x128xf32>
    %c0_31 = arith.constant 0 : index
    %c0_32 = arith.constant 0 : index
    %66 = vector.load %arg13[%c0_31, %c0_32] : memref<64x64xbf16, #tpu.memory_space<vmem>>, vector<64x64xbf16>
    %67 = arith.truncf %64 : vector<64x128xf32> to vector<64x128xbf16>
    %cst_33 = arith.constant dense<0.000000e+00> : vector<64x128xf32>
    %68 = tpu.matmul %66, %67, %cst_33 {dimension_numbers = #tpu.dot_dimension_numbers<[1], [0], [0], [1], [0, 0, 1, 1], [], []>} : vector<64x64xbf16>, vector<64x128xbf16>, vector<64x128xf32> -> vector<64x128xf32>
    %69 = vector.extract_strided_slice %26 {offsets = [32, 0], sizes = [32, 128], strides = [1, 1]} : vector<64x128xf32> to vector<32x128xf32>
    %c0_34 = arith.constant 0 : index
    %c0_35 = arith.constant 0 : index
    %70 = vector.load %arg14[%c0_34, %c0_35] : memref<64x32xbf16, #tpu.memory_space<vmem>>, vector<64x32xbf16>
    %71 = arith.truncf %69 : vector<32x128xf32> to vector<32x128xbf16>
    %cst_36 = arith.constant dense<0.000000e+00> : vector<64x128xf32>
    %72 = tpu.matmul %70, %71, %cst_36 {dimension_numbers = #tpu.dot_dimension_numbers<[1], [0], [0], [1], [0, 0, 1, 1], [], []>} : vector<64x32xbf16>, vector<32x128xbf16>, vector<64x128xf32> -> vector<64x128xf32>
    %73 = arith.addf %68, %72 : vector<64x128xf32>
    %c0_37 = arith.constant 0 : index
    %c0_38 = arith.constant 0 : index
    %74 = vector.load %arg15[%c0_37, %c0_38] : memref<64x8xbf16, #tpu.memory_space<vmem>>, vector<64x8xbf16>
    %75 = arith.truncf %18 : vector<8x128xf32> to vector<8x128xbf16>
    %cst_39 = arith.constant dense<0.000000e+00> : vector<64x128xf32>
    %76 = tpu.matmul %74, %75, %cst_39 {dimension_numbers = #tpu.dot_dimension_numbers<[1], [0], [0], [1], [0, 0, 1, 1], [], []>} : vector<64x8xbf16>, vector<8x128xbf16>, vector<64x128xf32> -> vector<64x128xf32>
    %77 = arith.addf %73, %76 : vector<64x128xf32>
    %c0_40 = arith.constant 0 : index
    %c0_41 = arith.constant 0 : index
    %78 = vector.load %arg16[%c0_40, %c0_41] : memref<64x1xf32, #tpu.memory_space<vmem>>, vector<64x1xf32>
    %79 = vector.broadcast %78 : vector<64x1xf32> to vector<64x128xf32>
    %80 = arith.addf %77, %79 : vector<64x128xf32>
    %cst_42 = arith.constant 0.000000e+00 : f32
    %81 = vector.broadcast %cst_42 : f32 to vector<64x128xf32>
    %82 = arith.maximumf %80, %81 : vector<64x128xf32>
    %c0_43 = arith.constant 0 : index
    %c0_44 = arith.constant 0 : index
    %83 = vector.load %arg17[%c0_43, %c0_44] : memref<3x64xbf16, #tpu.memory_space<vmem>>, vector<3x64xbf16>
    %84 = arith.truncf %82 : vector<64x128xf32> to vector<64x128xbf16>
    %cst_45 = arith.constant dense<0.000000e+00> : vector<3x128xf32>
    %85 = tpu.matmul %83, %84, %cst_45 {dimension_numbers = #tpu.dot_dimension_numbers<[1], [0], [0], [1], [0, 0, 1, 1], [], []>} : vector<3x64xbf16>, vector<64x128xbf16>, vector<3x128xf32> -> vector<3x128xf32>
    %c0_46 = arith.constant 0 : index
    %c0_47 = arith.constant 0 : index
    %86 = vector.load %arg18[%c0_46, %c0_47] : memref<3x1xf32, #tpu.memory_space<vmem>>, vector<3x1xf32>
    %87 = vector.broadcast %86 : vector<3x1xf32> to vector<3x128xf32>
    %88 = arith.addf %85, %87 : vector<3x128xf32>
    %89 = tpu.concatenate %88, %65 in 0 : vector<3x128xf32>, vector<1x128xf32> -> vector<4x128xf32>
    %90 = math.absf %89 : vector<4x128xf32>
    %cst_48 = arith.constant 0.000000e+00 : f32
    %91 = vector.broadcast %cst_48 : f32 to vector<4x128xf32>
    %92 = arith.subf %91, %90 : vector<4x128xf32>
    %93 = math.exp %92 : vector<4x128xf32>
    %cst_49 = arith.constant 0.000000e+00 : f32
    %94 = vector.broadcast %cst_49 : f32 to vector<4x128xf32>
    %95 = arith.cmpf oge, %89, %94 : vector<4x128xf32>
    %cst_50 = arith.constant 1.000000e+00 : f32
    %96 = vector.broadcast %cst_50 : f32 to vector<4x128xf32>
    %97 = arith.select %95, %96, %93 : vector<4x128xi1>, vector<4x128xf32>
    %cst_51 = arith.constant 1.000000e+00 : f32
    %98 = vector.broadcast %cst_51 : f32 to vector<4x128xf32>
    %99 = arith.addf %98, %93 : vector<4x128xf32>
    %100 = arith.divf %97, %99 : vector<4x128xf32>
    %cst_52 = arith.constant 0.000000e+00 : f32
    %101 = vector.broadcast %cst_52 : f32 to vector<4x128xf32>
    %102 = arith.maximumf %89, %101 : vector<4x128xf32>
    %cst_53 = arith.constant 1.000000e+00 : f32
    %103 = vector.broadcast %cst_53 : f32 to vector<4x128xf32>
    %104 = arith.addf %103, %93 : vector<4x128xf32>
    %105 = math.log %104 : vector<4x128xf32>
    %106 = arith.addf %102, %105 : vector<4x128xf32>
    %107 = tpu.iota {dimensions = array<i32: 0>} : vector<4x1xi32>
    %c3_i32 = arith.constant 3 : i32
    %108 = vector.broadcast %c3_i32 : i32 to vector<4x1xi32>
    %109 = arith.cmpi slt, %107, %108 : vector<4x1xi32>
    %110 = vector.shape_cast %109 : vector<4x1xi1> to vector<4x1xi1>
    %111 = vector.broadcast %110 : vector<4x1xi1> to vector<4x128xi1>
    %112 = arith.select %111, %100, %106 : vector<4x128xi1>, vector<4x128xf32>
    %c0_54 = arith.constant 0 : index
    %c0_55 = arith.constant 0 : index
    %113 = vector.load %arg19[%c0_54, %c0_55] : memref<4x128xf32, #tpu.memory_space<vmem>>, vector<4x128xf32>
    tpu.vector_store %arg19[%c0_54, %c0_55], %112 {strides = array<i32>} : memref<4x128xf32, #tpu.memory_space<vmem>>, vector<4x128xf32>,
    return
  }
  func.func @transform_0(%arg0: i32) -> (i32, i32) {
    %c0_i32 = arith.constant 0 : i32
    %c0_i32_0 = arith.constant 0 : i32
    return %c0_i32, %arg0 : i32, i32
  }
  func.func @transform_1(%arg0: i32) -> (i32, i32) {
    %c0_i32 = arith.constant 0 : i32
    %c0_i32_0 = arith.constant 0 : i32
    %c0_i32_1 = arith.constant 0 : i32
    return %c0_i32, %c0_i32_0 : i32, i32
  }
  func.func @transform_2(%arg0: i32) -> (i32, i32) {
    %c0_i32 = arith.constant 0 : i32
    %c0_i32_0 = arith.constant 0 : i32
    %c0_i32_1 = arith.constant 0 : i32
    return %c0_i32, %c0_i32_0 : i32, i32
  }
  func.func @transform_3(%arg0: i32) -> (i32, i32) {
    %c0_i32 = arith.constant 0 : i32
    %c0_i32_0 = arith.constant 0 : i32
    %c0_i32_1 = arith.constant 0 : i32
    return %c0_i32, %c0_i32_0 : i32, i32
  }
  func.func @transform_4(%arg0: i32) -> (i32, i32) {
    %c0_i32 = arith.constant 0 : i32
    %c0_i32_0 = arith.constant 0 : i32
    %c0_i32_1 = arith.constant 0 : i32
    return %c0_i32, %c0_i32_0 : i32, i32
  }
  func.func @transform_5(%arg0: i32) -> (i32, i32) {
    %c0_i32 = arith.constant 0 : i32
    %c0_i32_0 = arith.constant 0 : i32
    %c0_i32_1 = arith.constant 0 : i32
    return %c0_i32, %c0_i32_0 : i32, i32
  }
  func.func @transform_6(%arg0: i32) -> (i32, i32) {
    %c0_i32 = arith.constant 0 : i32
    %c0_i32_0 = arith.constant 0 : i32
    %c0_i32_1 = arith.constant 0 : i32
    return %c0_i32, %c0_i32_0 : i32, i32
  }
  func.func @transform_7(%arg0: i32) -> (i32, i32) {
    %c0_i32 = arith.constant 0 : i32
    %c0_i32_0 = arith.constant 0 : i32
    %c0_i32_1 = arith.constant 0 : i32
    return %c0_i32, %c0_i32_0 : i32, i32
  }
  func.func @transform_8(%arg0: i32) -> (i32, i32) {
    %c0_i32 = arith.constant 0 : i32
    %c0_i32_0 = arith.constant 0 : i32
    %c0_i32_1 = arith.constant 0 : i32
    return %c0_i32, %c0_i32_0 : i32, i32
  }
  func.func @transform_9(%arg0: i32) -> (i32, i32) {
    %c0_i32 = arith.constant 0 : i32
    %c0_i32_0 = arith.constant 0 : i32
    %c0_i32_1 = arith.constant 0 : i32
    return %c0_i32, %c0_i32_0 : i32, i32
  }
  func.func @transform_10(%arg0: i32) -> (i32, i32) {
    %c0_i32 = arith.constant 0 : i32
    %c0_i32_0 = arith.constant 0 : i32
    %c0_i32_1 = arith.constant 0 : i32
    return %c0_i32, %c0_i32_0 : i32, i32
  }
  func.func @transform_11(%arg0: i32) -> (i32, i32) {
    %c0_i32 = arith.constant 0 : i32
    %c0_i32_0 = arith.constant 0 : i32
    %c0_i32_1 = arith.constant 0 : i32
    return %c0_i32, %c0_i32_0 : i32, i32
  }
  func.func @transform_12(%arg0: i32) -> (i32, i32) {
    %c0_i32 = arith.constant 0 : i32
    %c0_i32_0 = arith.constant 0 : i32
    %c0_i32_1 = arith.constant 0 : i32
    return %c0_i32, %c0_i32_0 : i32, i32
  }
  func.func @transform_13(%arg0: i32) -> (i32, i32) {
    %c0_i32 = arith.constant 0 : i32
    %c0_i32_0 = arith.constant 0 : i32
    %c0_i32_1 = arith.constant 0 : i32
    return %c0_i32, %c0_i32_0 : i32, i32
  }
  func.func @transform_14(%arg0: i32) -> (i32, i32) {
    %c0_i32 = arith.constant 0 : i32
    %c0_i32_0 = arith.constant 0 : i32
    %c0_i32_1 = arith.constant 0 : i32
    return %c0_i32, %c0_i32_0 : i32, i32
  }
  func.func @transform_15(%arg0: i32) -> (i32, i32) {
    %c0_i32 = arith.constant 0 : i32
    %c0_i32_0 = arith.constant 0 : i32
    %c0_i32_1 = arith.constant 0 : i32
    return %c0_i32, %c0_i32_0 : i32, i32
  }
  func.func @transform_16(%arg0: i32) -> (i32, i32) {
    %c0_i32 = arith.constant 0 : i32
    %c0_i32_0 = arith.constant 0 : i32
    %c0_i32_1 = arith.constant 0 : i32
    return %c0_i32, %c0_i32_0 : i32, i32
  }
  func.func @transform_17(%arg0: i32) -> (i32, i32) {
    %c0_i32 = arith.constant 0 : i32
    %c0_i32_0 = arith.constant 0 : i32
    %c0_i32_1 = arith.constant 0 : i32
    return %c0_i32, %c0_i32_0 : i32, i32
  }
  func.func @transform_18(%arg0: i32) -> (i32, i32) {
    %c0_i32 = arith.constant 0 : i32
    %c0_i32_0 = arith.constant 0 : i32
    return %c0_i32, %arg0 : i32, i32
  }
}

</mosaic_0001>

<bundles_post_ra>
// kernel: lumen_background_forward.1
= control target key start
LH: loop header
LB: loop body
LE: loop exit
PB: predicated region body
PF: predicated region fallthrough
CT: control target
= control target key end

     0   :  { %s4775_s0 = inlined_call_operand.vmem [shape: f32[24,256], index: 0, kind: input, shape index: {}]   ;;  %s4776_s1 = inlined_call_operand.vmem [shape: f32[64,1], index: 1, kind: input, shape index: {}]   ;;  %s4777_s2 = inlined_call_operand.vmem [shape: f32[64,1], index: 2, kind: input, shape index: {}]   ;;  %s4778_s3 = inlined_call_operand.vmem [shape: bf16[64,32], index: 3, kind: input, shape index: {}]   ;;  %s4779_s4 = inlined_call_operand.vmem [shape: bf16[64,4], index: 4, kind: input, shape index: {}]   ;;  %s4780_s5 = inlined_call_operand.vmem [shape: f32[64,1], index: 5, kind: input, shape index: {}]   ;;  %s4781_s6 = inlined_call_operand.vmem [shape: bf16[64,64], index: 6, kind: input, shape index: {}]   ;;  %s4782_s7 = inlined_call_operand.vmem [shape: f32[64,1], index: 7, kind: input, shape index: {}]   ;;  %s4783_s8 = inlined_call_operand.vmem [shape: bf16[64,64], index: 8, kind: input, shape index: {}]   ;;  %s4784_s9 = inlined_call_operand.vmem [shape: f32[64,1], index: 9, kind: input, shape index: {}]   ;;  %s4785_s10 = inlined_call_operand.vmem [shape: bf16[65,64], index: 10, kind: input, shape index: {}]   ;;  %s4786_s11 = inlined_call_operand.vmem [shape: f32[65,1], index: 11, kind: input, shape index: {}]   ;;  %s4787_s12 = inlined_call_operand.vmem [shape: bf16[64,64], index: 12, kind: input, shape index: {}]   ;;  %s4788_s13 = inlined_call_operand.vmem [shape: bf16[64,32], index: 13, kind: input, shape index: {}]   ;;  %s4789_s14 = inlined_call_operand.vmem [shape: bf16[64,8], index: 14, kind: input, shape index: {}]   ;;  %s4790_s15 = inlined_call_operand.vmem [shape: f32[64,1], index: 15, kind: input, shape index: {}]   ;;  %s4791_s16 = inlined_call_operand.vmem [shape: bf16[3,64], index: 16, kind: input, shape index: {}]   ;;  %s4792_s17 = inlined_call_operand.vmem [shape: f32[3,1], index: 17, kind: input, shape index: {}]   ;;  %s4793_s18 = inlined_call_operand.vmem [shape: f32[4,256], index: 18, kind: output, shape index: {}]  }
   0x1   :  { %4806 = sst [smem:[#allocation13_spill]] %s4775_s0 }
   0x2   :  { %4807 = sst [smem:[#allocation14_spill]] %s4776_s1 }
   0x3   :  { %4808 = sst [smem:[#allocation15_spill]] %s4777_s2 }
   0x4   :  { %s3523_s27 = smov 0   ;;  %s3525_s28 = smov 0  }
   0x5   :  { %s3527_s29 = smov 0  }
   0x6 LB: > { %4809 = sst [smem:[#allocation3_spill]] %s3413_s28  ;;  %s3540_s0 = sadd.s32 1, %s3417_s29   ;;  %s3417_s29 = sphi %s3527_s29, %s4872_s29   ;;  %s3413_s28 = sphi %s3525_s28, %s4871_s28   ;;  %s3409_s27 = sphi %s3523_s27, %s4870_s27  }
   0x7   : > { %s32_s19 = ssub.s32 %s3417_s29, %s3540_s0  ;;  %s35_s1 = sadd.s32 1, %s3413_s28 }
   0x8   : > { %p33_p0 = scmp.eq.s32.totalorder %s32_s19, 0  ;;  %p42_p1 = scmp.ne.s32.totalorder %s3413_s28, %s3409_s27 }
   0x9   : > { %p43_p2 = scmp.eq.s32.totalorder %s3417_s29, 0  ;;  %p2929_p4 = scmp.ge.s32.totalorder %s3417_s29, 2 }
   0xa   : > { %s3549_s20 = scalar_select %p33_p0, %s3413_s28, %s35_s1  }
   0xb   : > { %p44_p3 = por %p43_p2, %p42_p1  ;;  %502 = sbr.rel (%p2929_p4) target bundleno = 30 (0x1e), region = 84 }
   0xc   : > { %4810 = sst [smem:[#allocation4_spill]] %s3549_s20 }
  0x12   : > { %505 = sbr.rel (!%p44_p3) target bundleno = 30 (0x1e), region = 88  ;;  %s507_s21 = sand.u32 (%p44_p3), 1, %s3413_s28  }
  0x13   : > { %s2930_s22 = sshll.u32 (%p44_p3), %s3417_s29, 3  ;;  %s3252_s2 = smul.u32 (%p44_p3), 24, %s507_s21 }
  0x14   : > { %s4811_s25 = sld [smem:[#allocation13_spill]] (%p44_p3) }
  0x15   : > { %s509_s19 = scalar_lea.vmem (%p44_p3), [#allocation2], %s3252_s2 }
  0x1a   : > { %s511_s26 = scalar_lea.vmem %s4811_s25, %s2930_s22 }
  0x1b   : > { %v543_v0 = vld [vmem:[%s511_s26] sm:$0xff]  ;;  %v545_v1 = vld [vmem:[%s511_s26 + $0x10] sm:$0xff] }
  0x1c   : > { %v547_v2 = vld [vmem:[%s511_s26 + $0x20] sm:$0xff]  ;;  %544 = vst [vmem:[%s509_s19] sm:$0xff] %v543_v0  ;;  %546 = vst [vmem:[%s509_s19 + $0x8] sm:$0xff] %v545_v1 }
  0x1d   : > { %548 = vst [vmem:[%s509_s19 + $0x10] sm:$0xff] %v547_v2 }
  0x1e PF: > { %p2931_p5 = scmp.ge.s32.totalorder %s3417_s29, 1  ;;  %p553_p6 = scmp.lt.s32.totalorder %s3417_s29, 3 }
  0x20   : > { %p554_p7 = pnand %p2931_p5, %p553_p6 }
  0x22   : > { %557 = sbr.rel (%p554_p7) target bundleno = 1770 (0x6ea), region = 126 }
  0x29   : > { %s4812_s30 = sld [smem:[#allocation15_spill]]  ;;  %s4813_s24 = sld [smem:[#allocation14_spill]]  ;;  %v3419_v5 = vmov 0   ;;  %v1811_v12 = vld [vmem:[%s4780_s5 + $0x8] sm:$0xff]  ;;  %v1810_v13 = vld [vmem:[%s4780_s5] sm:$0xff]  ;;  %v1813_v14 = vld [vmem:[%s4780_s5 + $0x18] sm:$0xff]  ;;  %v629_v0 = vlaneseq }
  0x2a   : > { %3320 = vset.pattern.permute.xlu1 %v3419_v5  ;;  %3319 = vset.pattern.permute.xlu0 %v3419_v5  ;;  %v1812_v15 = vld [vmem:[%s4780_s5 + $0x10] sm:$0xff]  ;;  %v1815_v16 = vld [vmem:[%s4780_s5 + $0x28] sm:$0xff]  ;;  %v1814_v17 = vld [vmem:[%s4780_s5 + $0x20] sm:$0xff]  ;;  %s560_s26 = sand.u32 1, %s3409_s27   ;;  %vm4803_vm0 = vcmask 1043456   ;;  %vm1643_vm11 = vcmask 1041408  }
  0x2b   : > { %v1817_v18 = vld [vmem:[%s4780_s5 + $0x38] sm:$0xff]  ;;  %v1816_v19 = vld [vmem:[%s4780_s5 + $0x30] sm:$0xff]  ;;  %v1887_v20 = vld [vmem:[%s4782_s7 + $0x8] sm:$0xff]  ;;  %s3253_s23 = smul.u32 24, %s560_s26  ;;  %vm1630_vm12 = vcmask 31744   ;;  %s4867_s25 = sadd.s32 4294967295, %s3417_s29  }
  0x2c   : > { %v1886_v21 = vld [vmem:[%s4782_s7] sm:$0xff]  ;;  %v1889_v22 = vld [vmem:[%s4782_s7 + $0x18] sm:$0xff]  ;;  %v1888_v23 = vld [vmem:[%s4782_s7 + $0x10] sm:$0xff]  ;;  %p612_p8 = scmp.lt.s32.totalorder %s4867_s25, 1  ;;  %s4868_s27 = smov %s4867_s25 }
  0x2d   : > { %v1891_v24 = vld [vmem:[%s4782_s7 + $0x28] sm:$0xff]  ;;  %v1890_v25 = vld [vmem:[%s4782_s7 + $0x20] sm:$0xff]  ;;  %v1893_v26 = vld [vmem:[%s4782_s7 + $0x38] sm:$0xff]  ;;  %s3692_s26 = scalar_lea.vmem [#allocation2], %s3253_s23 }
  0x2e   : > { %v1892_v27 = vld [vmem:[%s4782_s7 + $0x30] sm:$0xff]  ;;  %v2053_v28 = vld [vmem:[%s4784_s9 + $0x8] sm:$0xff]  ;;  %v2052_v29 = vld [vmem:[%s4784_s9] sm:$0xff]  ;;  %s4874_s27 = smov (!%p612_p8, %s4868_s27), 1 }
  0x2f   : > { %v703_v3 = vld [vmem:[%s4812_s30] sm:$0xff]  ;;  %v704_v6 = vld [vmem:[%s4812_s30 + $0x8] sm:$0xff]  ;;  %v650_v8 = vld [vmem:[%s4813_s24 + $0x18] sm:$0xff]  ;;  %s2932_s23 = sshll.u32 %s4874_s27, 2 }
  0x30   : > { %v647_v4 = vld [vmem:[%s4813_s24] sm:$0xff]  ;;  %713 = vperm.xlu1 %3320, %v703_v3   ;;  %v648_v7 = vld [vmem:[%s4813_s24 + $0x8] sm:$0xff]  ;;  %v649_v9 = vld [vmem:[%s4813_s24 + $0x10] sm:$0xff]  ;;  %v3731_v3 = vshrl.u32 %v629_v0, 7  ;;  %s615_s21 = scalar_lea.vmem %s4793_s18, %s2932_s23 }
  0x31   : > { %657 = vperm.xlu0 %3319, %v647_v4   ;;  %v706_v10 = vld [vmem:[%s4812_s30 + $0x18] sm:$0xff]  ;;  %v705_v11 = vld [vmem:[%s4812_s30 + $0x10] sm:$0xff]  ;;  %v2057_v32 = vld [vmem:[%s4784_s9 + $0x28] sm:$0xff] }
  0x32   : > { %v2055_v30 = vld [vmem:[%s4784_s9 + $0x18] sm:$0xff]  ;;  %v2054_v31 = vld [vmem:[%s4784_s9 + $0x10] sm:$0xff]  ;;  %v2056_v33 = vld [vmem:[%s4784_s9 + $0x20] sm:$0xff]  ;;  %4814 = vst [vmem:[#allocation5_spill] sm:$0xff] %v3731_v3 }
  0x33   : > { %v2059_v34 = vld [vmem:[%s4784_s9 + $0x38] sm:$0xff]  ;;  %v2058_v35 = vld [vmem:[%s4784_s9 + $0x30] sm:$0xff]  ;;  %v652_v36 = vld [vmem:[%s4813_s24 + $0x28] sm:$0xff] }
  0x34   : > { %718 = vperm.xlu1 %3320, %v704_v6   ;;  %v651_v37 = vld [vmem:[%s4813_s24 + $0x20] sm:$0xff]  ;;  %v708_v38 = vld [vmem:[%s4812_s30 + $0x28] sm:$0xff]  ;;  %v654_v40 = vld [vmem:[%s4813_s24 + $0x38] sm:$0xff]  ;;  %v631_v6 = vsub.s32 0, %v3731_v3 }
  0x35   : > { %662 = vperm.xlu0 %3319, %v648_v7   ;;  %v707_v39 = vld [vmem:[%s4812_s30 + $0x20] sm:$0xff]  ;;  %v653_v41 = vld [vmem:[%s4813_s24 + $0x30] sm:$0xff]  ;;  %v710_v42 = vld [vmem:[%s4812_s30 + $0x38] sm:$0xff] }
  0x36   : > { %v709_v43 = vld [vmem:[%s4812_s30 + $0x30] sm:$0xff]  ;;  %v2219_v44 = vld [vmem:[%s4786_s11 + $0x8] sm:$0xff]  ;;  %v2218_v45 = vld [vmem:[%s4786_s11] sm:$0xff] }
  0x37   : > { %v2221_v46 = vld [vmem:[%s4786_s11 + $0x18] sm:$0xff]  ;;  %v2220_v47 = vld [vmem:[%s4786_s11 + $0x10] sm:$0xff]  ;;  %v2223_v50 = vld [vmem:[%s4786_s11 + $0x28] sm:$0xff] }
  0x38   : > { %672 = vperm.xlu1 %3320, %v650_v8   ;;  %v617_v48 = vld [vmem:[%s3692_s26] sm:$0xff]  ;;  %v2224_v54 = vld [vmem:[%s4786_s11 + $0x30] sm:$0xff]  ;;  %v2725_v57 = vld [vmem:[%s4790_s15 + $0x8] sm:$0xff] }
  0x39   : > { %667 = vperm.xlu0 %3319, %v649_v9   ;;  %v620_v49 = vmul.f32 %v617_v48, %v617_v48  ;;  %v2222_v51 = vld [vmem:[%s4786_s11 + $0x20] sm:$0xff]  ;;  %v2225_v53 = vld [vmem:[%s4786_s11 + $0x38] sm:$0xff]  ;;  %v2726_v61 = vld [vmem:[%s4790_s15 + $0x10] sm:$0xff] }
  0x3a   : > { %v2724_v58 = vld [vmem:[%s4790_s15] sm:$0xff]  ;;  %v2727_v60 = vld [vmem:[%s4790_s15 + $0x18] sm:$0xff]  ;;  %v2729_v62 = vld [vmem:[%s4790_s15 + $0x28] sm:$0xff] }
  0x3b   : > { %v622_v52 = vrot.slane %v620_v49, 1  ;;  %v625_v56 = vrot.slane %v620_v49, 2  ;;  %v2728_v63 = vld [vmem:[%s4790_s15 + $0x20] sm:$0xff]  ;;  %v2731_v1 = vld [vmem:[%s4790_s15 + $0x38] sm:$0xff]  ;;  %v2730_v2 = vld [vmem:[%s4790_s15 + $0x30] sm:$0xff] }
  0x3c   : > { %728 = vperm.xlu1 %3320, %v706_v10   ;;  %v2793_v4 = vld [vmem:[%s4792_s17] sm:$0x7] }
  0x3d   : > { %723 = vperm.xlu0 %3319, %v705_v11   ;;  %v624_v55 = vadd.f32 %v622_v52, %v620_v49  ;;  %v2226_v5 = vld [vmem:[%s4786_s11 + $0x40] sm:$0x1] }
  0x3f   : > { %v627_v59 = vadd.f32 %v625_v56, %v624_v55 }
  0x40   : > { %1825 = vperm.xlu1 %3320, %v1811_v12  }
  0x41   : > { %1820 = vperm.xlu0 %3319, %v1810_v13   ;;  %3354 = vrsqrt.f32 %v627_v59 }
  0x44   : > { %1835 = vperm.xlu1 %3320, %v1813_v14  }
  0x45   : > { %1830 = vperm.xlu0 %3319, %v1812_v15  }
  0x48   : > { %1845 = vperm.xlu1 %3320, %v1815_v16  }
  0x49   : > { %1840 = vperm.xlu0 %3319, %v1814_v17  }
  0x4b   : > { %v3355_v7 = vpop.eup %3354 }
  0x4c   : > { %1855 = vperm.xlu1 %3320, %v1817_v18   ;;  %v632_v8 = vrot.slane %v3355_v7, %v631_v6 }
  0x4d   : > { %1850 = vperm.xlu0 %3319, %v1816_v19  }
  0x4e   : > { %v3740_v9 = vmul.f32 %v632_v8, %v617_v48 }
  0x50   : > { %1901 = vperm.xlu1 %3320, %v1887_v20   ;;  %v635_v10 = vrot.slane %v3740_v9, 4 }
  0x51   : > { %1896 = vperm.xlu0 %3319, %v1886_v21  }
  0x52   : > { %v644_v11 = vsel %vm4803_vm0, %v3740_v9, %v635_v10 }
  0x54   : > { %1911 = vperm.xlu1 %3320, %v1889_v22  }
  0x55   : > { %1906 = vperm.xlu0 %3319, %v1888_v23  }
  0x58   : > { %1921 = vperm.xlu1 %3320, %v1891_v24  }
  0x59   : > { %1916 = vperm.xlu0 %3319, %v1890_v25  }
  0x5c   : > { %1931 = vperm.xlu1 %3320, %v1893_v26  }
  0x5d   : > { %1926 = vperm.xlu0 %3319, %v1892_v27  }
  0x60   : > { %2067 = vperm.xlu1 %3320, %v2053_v28  }
  0x61   : > { %2062 = vperm.xlu0 %3319, %v2052_v29  }
  0x64   : > { %2077 = vperm.xlu1 %3320, %v2055_v30  }
  0x65   : > { %2072 = vperm.xlu0 %3319, %v2054_v31  }
  0x68   : > { %2087 = vperm.xlu1 %3320, %v2057_v32  }
  0x69   : > { %2082 = vperm.xlu0 %3319, %v2056_v33  }
  0x6c   : > { %2097 = vperm.xlu1 %3320, %v2059_v34  }
  0x6d   : > { %2092 = vperm.xlu0 %3319, %v2058_v35  }
  0x70   : > { %682 = vperm.xlu1 %3320, %v652_v36   ;;  %v3420_v36 = vmov 1326507024  }
  0x71   : > { %677 = vperm.xlu0 %3319, %v651_v37  }
  0x74   : > { %738 = vperm.xlu1 %3320, %v708_v38  }
  0x75   : > { %733 = vperm.xlu0 %3319, %v707_v39  }
  0x78   : > { %692 = vperm.xlu1 %3320, %v654_v40  }
  0x79   : > { %687 = vperm.xlu0 %3319, %v653_v41  }
  0x7c   : > { %748 = vperm.xlu1 %3320, %v710_v42   ;;  %v3421_v42 = vmov 2131351028  }
  0x7d   : > { %743 = vperm.xlu0 %3319, %v709_v43  }
  0x80   : > { %2234 = vperm.xlu1 %3320, %v2219_v44   ;;  %v3422_v44 = vmov 920167782  }
  0x81   : > { %2229 = vperm.xlu0 %3319, %v2218_v45  }
  0x84   : > { %2244 = vperm.xlu1 %3320, %v2221_v46  }
  0x85   : > { %2239 = vperm.xlu0 %3319, %v2220_v47   ;;  %v3423_v47 = vmov 2102212464  }
  0x88   : > { %2254 = vperm.xlu1 %3320, %v2223_v50   ;;  %v3424_v50 = vmov 2475754826  }
  0x89   : > { %2249 = vperm.xlu0 %3319, %v2222_v51  }
  0x8c   : > { %2264 = vperm.xlu1 %3320, %v2225_v53  }
  0x8d   : > { %2259 = vperm.xlu0 %3319, %v2224_v54  }
  0x90   : > { %2739 = vperm.xlu1 %3320, %v2725_v57  }
  0x91   : > { %2734 = vperm.xlu0 %3319, %v2724_v58   ;;  %v4800_v58 = vmov 683565275  }
  0x94   : > { %2749 = vperm.xlu1 %3320, %v2727_v60  }
  0x95   : > { %2744 = vperm.xlu0 %3319, %v2726_v61  }
  0x98   : > { %2759 = vperm.xlu1 %3320, %v2729_v62  }
  0x99   : > { %2754 = vperm.xlu0 %3319, %v2728_v63  }
  0x9c   : > { %2769 = vperm.xlu1 %3320, %v2731_v1  }
  0x9d   : > { %2764 = vperm.xlu0 %3319, %v2730_v2  }
  0xa0   : > { %2796 = vperm.xlu1 %3320, %v2793_v4  }
  0xa1   : > { %2269 = vperm.xlu0 %3319, %v2226_v5  }
  0xaf   : > { %v714_v14 = vpop.permute.xlu1 %713 }
  0xb0   : > { %v658_v12 = vpop.permute.xlu0 %657 }
  0xb1   : > { %v695_v13 = vmul.f32 %v658_v12, %v644_v11 }
  0xb3   : > { %v3745_v15 = vadd.f32 %v714_v14, %v695_v13  ;;  %v719_v20 = vpop.permute.xlu1 %718 }
  0xb4   : > { %v663_v18 = vpop.permute.xlu0 %662 }
  0xb5   : > { %v762_v16 = vand.u32 2139095040, %v3745_v15  ;;  %v696_v21 = vmul.f32 %v663_v18, %v644_v11  ;;  %v759_v35 = vand.u32 2147483647, %v3745_v15 }
  0xb7   : > { %v763_v17 = vshrl.u32 %v762_v16, 23  ;;  %v3748_v23 = vadd.f32 %v719_v20, %v696_v21  ;;  %v673_v24 = vpop.permute.xlu1 %672  ;;  %v766_v46 = vand.u32 8388607, %v759_v35 }
  0xb8   : > { %v698_v28 = vmul.f32 %v673_v24, %v644_v11  ;;  %v668_v39 = vpop.permute.xlu0 %667 }
  0xb9   : > { %v2933_v19 = vadd.s32 4294967169, %v763_v17  ;;  %v866_v25 = vand.u32 2139095040, %v3748_v23  ;;  %v863_v53 = vand.u32 2147483647, %v3748_v23  ;;  %v697_v5 = vmul.f32 %v668_v39, %v644_v11 }
  0xba   : > { %v767_v6 = vor.u32 8388608, %v766_v46 }
  0xbb   : > { %v769_v22 = vadd.s32 1, %v2933_v19  ;;  %v729_v27 = vpop.permute.xlu1 %728  ;;  %v867_v30 = vshrl.u32 %v866_v25, 23  ;;  %v870_v4 = vand.u32 8388607, %v863_v53 }
  0xbc   : > { %v3751_v31 = vadd.f32 %v729_v27, %v698_v28  ;;  %v724_v1 = vpop.permute.xlu0 %723  ;;  %v3779_v20 = vshll.u32 %v767_v6, 8  ;;  %v1609_v6 = vpack.c.bf16 %v3740_v9, %v3740_v9 }
  0xbd   : > { %vm770_vm1 = vcmp.gt.s32.totalorder %v769_v22, 0  ;;  %v2937_v33 = vadd.s32 4294967169, %v867_v30  ;;  %v3771_v10 = vadd.f32 %v724_v1, %v697_v5  ;;  %v871_v18 = vor.u32 8388608, %v870_v4 }
  0xbe   : > { %v771_v26 = vsel %vm770_vm1, %v769_v22, 0  ;;  %v1074_v34 = vand.u32 2139095040, %v3751_v31  ;;  %3250 = vmatprep.subr.msk.bf16.mxu0 %vm1643_vm11, %v1609_v6 }
  0xbf   : > { %v773_v29 = vand.u32 31, %v771_v26  ;;  %v873_v38 = vadd.s32 1, %v2937_v33  ;;  %v772_v41 = vshrl.u32 %v771_v26, 5  ;;  %v3790_v30 = vshll.u32 %v871_v18, 8 }
  0xc0   : > { %v1075_v40 = vshrl.u32 %v1074_v34, 23 }
  0xc1   : > { %v774_v32 = vsub.s32 32, %v773_v29  ;;  %v788_v45 = vshll.u32 %v3422_v44, %v773_v29  ;;  %v779_v51 = vshll.u32 %v3424_v50, %v773_v29  ;;  %vm874_vm2 = vcmp.gt.s32.totalorder %v873_v38, 0 }
  0xc2   : > { %v782_v55 = vshll.u32 %v3421_v42, %v773_v29  ;;  %v785_v56 = vshll.u32 %v3423_v47, %v773_v29  ;;  %v2945_v57 = vadd.s32 4294967169, %v1075_v40  ;;  %v776_v59 = vshll.u32 %v4800_v58, %v773_v29 }
  0xc3   : > { %v789_v37 = vshrl.u32 %v3420_v36, %v774_v32  ;;  %v780_v43 = vshrl.u32 %v3421_v42, %v774_v32  ;;  %v783_v48 = vshrl.u32 %v3423_v47, %v774_v32  ;;  %v786_v49 = vshrl.u32 %v3422_v44, %v774_v32 }
  0xc4   : > { %v777_v54 = vshrl.u32 %v3424_v50, %v774_v32  ;;  %vm794_vm3 = vcmp.lt.s32.totalorder %v772_v41, 4  ;;  %v875_v63 = vsel %vm874_vm2, %v873_v38, 0  ;;  %v1081_v0 = vadd.s32 1, %v2945_v57 }
  0xc5   : > { %v790_v52 = vor.u32 %v789_v37, %v788_v45  ;;  %v781_v60 = vor.u32 %v780_v43, %v779_v51  ;;  %v784_v61 = vor.u32 %v783_v48, %v782_v55  ;;  %v787_v62 = vor.u32 %v786_v49, %v785_v56 }
  0xc6   : > { %v778_v7 = vor.u32 %v777_v54, %v776_v59  ;;  %vm1082_vm4 = vcmp.gt.s32.totalorder %v1081_v0, 0  ;;  %vm791_vm5 = vcmp.lt.s32.totalorder %v772_v41, 1  ;;  %vm793_vm6 = vcmp.lt.s32.totalorder %v772_v41, 3 }
  0xc7   : > { %v804_v2 = vsel %vm794_vm3, %v790_v52, 1326507024  ;;  %v877_v8 = vand.u32 31, %v875_v63  ;;  %v800_v12 = vsel %vm794_vm3, %v787_v62, 920167782  ;;  %v803_v13 = vsel %vm791_vm5, %v781_v60, %v784_v61 }
  0xc8   : > { %v805_v14 = vsel %vm793_vm6, %v787_v62, %v804_v2  ;;  %v1083_v16 = vsel %vm1082_vm4, %v1081_v0, 0  ;;  %v796_v17 = vsel %vm794_vm3, %v784_v61, 2102212464  ;;  %v775_v11 = vshrl.u32 %v4800_v58, %v774_v32 }
  0xc9   : > { %vm792_vm7 = vcmp.lt.s32.totalorder %v772_v41, 2  ;;  %v799_v19 = vsel %vm791_vm5, %v778_v7, %v781_v60  ;;  %v801_v21 = vsel %vm793_vm6, %v784_v61, %v800_v12  ;;  %v3783_v24 = vsub.s32 32, %v877_v8 }
  0xca   : > { %v806_v22 = vsel %vm792_vm7, %v803_v13, %v805_v14  ;;  %v1085_v25 = vand.u32 31, %v1083_v16  ;;  %v795_v26 = vsel %vm791_vm5, %v775_v11, %v778_v7  ;;  %v797_v27 = vsel %vm793_vm6, %v781_v60, %v796_v17  ;;  %v3321_v14 = vld [vmem:[%s4779_s4] sm:$0xff]  }
  0xcb   : > { %v3787_v28 = vshrl.u32 %v875_v63, 5  ;;  %v970_v29 = vand.u32 2139095040, %v3771_v10  ;;  %v1071_v32 = vand.u32 2147483647, %v3751_v31  ;;  %v802_v33 = vsel %vm792_vm7, %v799_v19, %v801_v21  ;;  %3096 = vmatprep.mubr.msk.bf16.mxu0 %vm1630_vm12, %v3321_v14 }
  0xcc   : > { %v3795_v34 = vmul.u32.u64.low %v3779_v20, %v806_v22  ;;  %v3796_v37 = vmul.u32.u64.high %v3779_v20, %v806_v22, %v3795_v34  ;;  %v967_v38 = vand.u32 2147483647, %v3771_v10  ;;  %v3800_v39 = vsel %vm792_vm7, %v795_v26, %v797_v27 }
  0xcd   : > { %v881_v40 = vshrl.u32 %v3424_v50, %v3783_v24  ;;  %v890_v43 = vshrl.u32 %v3422_v44, %v3783_v24  ;;  %v3806_v45 = vsub.s32 32, %v1085_v25  ;;  %v884_v46 = vshrl.u32 %v3421_v42, %v3783_v24 }
  0xce   : > { %v887_v48 = vshrl.u32 %v3423_v47, %v3783_v24  ;;  %vm895_vm8 = vcmp.lt.s32.totalorder %v3787_v28, 1  ;;  %v971_v49 = vshrl.u32 %v970_v29, 23  ;;  %v880_v52 = vshll.u32 %v4800_v58, %v877_v8 }
  0xcf   : > { %v3814_v41 = vmul.u32.u64.low %v3779_v20, %v802_v33  ;;  %v3815_v51 = vmul.u32.u64.high %v3779_v20, %v802_v33, %v3814_v41  ;;  %v889_v54 = vshll.u32 %v3423_v47, %v877_v8  ;;  %v883_v55 = vshll.u32 %v3424_v50, %v877_v8 }
  0xd0   : > { %v886_v56 = vshll.u32 %v3421_v42, %v877_v8  ;;  %v892_v57 = vshll.u32 %v3422_v44, %v877_v8  ;;  %vm897_vm9 = vcmp.lt.s32.totalorder %v3787_v28, 3  ;;  %v3824_v59 = vor.u32 %v881_v40, %v880_v52 }
  0xd1   : > { %v891_v60 = vor.u32 %v890_v43, %v889_v54  ;;  %v893_v61 = vshrl.u32 %v3420_v36, %v3783_v24  ;;  %v1098_v62 = vshrl.u32 %v3422_v44, %v3806_v45  ;;  %v3830_v63 = vor.u32 %v884_v46, %v883_v55  ;;  %v3322_v55 = vld [vmem:[%s4779_s4 + $0x8] sm:$0xff]  }
  0xd2   : > { %v3832_v0 = vor.u32 %v887_v48, %v886_v56  ;;  %v1101_v1 = vshrl.u32 %v3420_v36, %v3806_v45  ;;  %v2941_v2 = vadd.s32 4294967169, %v971_v49  ;;  %vm898_vm10 = vcmp.lt.s32.totalorder %v3787_v28, 4 }
  0xd3   : > { %v1089_v4 = vshrl.u32 %v3424_v50, %v3806_v45  ;;  %v1097_v5 = vshll.u32 %v3423_v47, %v1085_v25  ;;  %v3842_v7 = vshrl.u32 %v1083_v16, 5  ;;  %v1092_v8 = vshrl.u32 %v3421_v42, %v3806_v45 }
  0xd4   : > { %v1095_v12 = vshrl.u32 %v3423_v47, %v3806_v45  ;;  %v1100_v13 = vshll.u32 %v3422_v44, %v1085_v25  ;;  %v894_v17 = vor.u32 %v893_v61, %v892_v57  ;;  %v904_v18 = vsel %vm898_vm10, %v891_v60, 920167782 }
  0xd5   : > { %v1088_v9 = vshll.u32 %v4800_v58, %v1085_v25  ;;  %v1099_v16 = vor.u32 %v1098_v62, %v1097_v5  ;;  %v1091_v11 = vshll.u32 %v3424_v50, %v1085_v25  ;;  %v1094_v19 = vshll.u32 %v3421_v42, %v1085_v25 }
  0xd6   : > { %v1102_v21 = vor.u32 %v1101_v1, %v1100_v13  ;;  %v977_v22 = vadd.s32 1, %v2941_v2  ;;  %v903_v26 = vsel %vm895_vm8, %v3824_v59, %v3830_v63  ;;  %vm1106_vm13 = vcmp.lt.s32.totalorder %v3842_v7, 4 }
  0xd7   : > { %v3861_v27 = vor.u32 %v1089_v4, %v1088_v9  ;;  %v3863_v29 = vor.u32 %v1092_v8, %v1091_v11  ;;  %v3865_v33 = vor.u32 %v1095_v12, %v1094_v19  ;;  %v905_v25 = vsel %vm897_vm9, %v3832_v0, %v904_v18 }
  0xd8   : > { %vm978_vm14 = vcmp.gt.s32.totalorder %v977_v22, 0  ;;  %v908_v34 = vsel %vm898_vm10, %v894_v17, 1326507024  ;;  %v1112_v40 = vsel %vm1106_vm13, %v1099_v16, 920167782  ;;  %vm896_vm15 = vcmp.lt.s32.totalorder %v3787_v28, 2 }
  0xd9   : > { %v979_v43 = vsel %vm978_vm14, %v977_v22, 0  ;;  %v1078_v46 = vand.u32 8388607, %v1071_v32  ;;  %v1116_v48 = vsel %vm1106_vm13, %v1102_v21, 1326507024  ;;  %vm816_vm1 = vc.u32 %v3796_v37, %v3814_v41 }
  0xda   : > { %v981_v49 = vand.u32 31, %v979_v43  ;;  %v817_v52 = vadd.s32 1, %v3815_v51  ;;  %vm1103_vm2 = vcmp.lt.s32.totalorder %v3842_v7, 1  ;;  %vm1105_vm3 = vcmp.lt.s32.totalorder %v3842_v7, 3 }
  0xdb   : > { %v1645_v54 = vsel %vm1643_vm11, %v1609_v6, 0  ;;  %v3893_v56 = vsel %vm896_vm15, %v903_v26, %v905_v25  ;;  %v1111_v57 = vsel %vm1103_vm2, %v3861_v27, %v3863_v29  ;;  %v1113_v61 = vsel %vm1105_vm3, %v3865_v33, %v1112_v40 }
  0xdc   : > { %v982_v62 = vsub.s32 32, %v981_v49  ;;  %3095 = vmatpush3.bf16.msra.mxu0 %v1645_v54  ;;  %v907_v1 = vsel %vm895_vm8, %v3830_v63, %v3832_v0  ;;  %v909_v2 = vsel %vm897_vm9, %v891_v60, %v908_v34  ;;  %v1115_v4 = vsel %vm1103_vm2, %v3863_v29, %v3865_v33 }
  0xdd   : > { %v1117_v5 = vsel %vm1105_vm3, %v1099_v16, %v1116_v48  ;;  %v1079_v6 = vor.u32 8388608, %v1078_v46  ;;  %vm1104_vm4 = vcmp.lt.s32.totalorder %v3842_v7, 2  ;;  %v974_v8 = vand.u32 8388607, %v967_v38 }
  0xde   : > { %v985_v12 = vshrl.u32 %v3424_v50, %v982_v62  ;;  %v3920_v13 = vmul.u32.u64.low %v3790_v30, %v3893_v56  ;;  %v3921_v60 = vmul.u32.u64.high %v3790_v30, %v3893_v56, %v3920_v13  ;;  %v1114_v14 = vsel %vm1104_vm4, %v1111_v57, %v1113_v61 }
  0xdf   : > { %v988_v17 = vshrl.u32 %v3421_v42, %v982_v62  ;;  %3097 = vmatmul.mubr.msk.bf16.vlgmr.msra.gmra.mrb[0].mxu0 %vm1630_vm12, %v3322_v55  ;;  %v1118_v18 = vsel %vm1104_vm4, %v1115_v4, %v1117_v5  ;;  %v984_v9 = vshll.u32 %v4800_v58, %v981_v49  ;;  %v987_v16 = vshll.u32 %v3424_v50, %v981_v49 }
  0xe0   : > { %v991_v11 = vshrl.u32 %v3423_v47, %v982_v62  ;;  %v980_v19 = vshrl.u32 %v979_v43, 5  ;;  %v990_v21 = vshll.u32 %v3421_v42, %v981_v49  ;;  %v993_v22 = vshll.u32 %v3423_v47, %v981_v49 }
  0xe1   : > { %v994_v26 = vshrl.u32 %v3422_v44, %v982_v62  ;;  %v3936_v25 = vshll.u32 %v1079_v6, 8  ;;  %v975_v34 = vor.u32 8388608, %v974_v8  ;;  %v986_v40 = vor.u32 %v985_v12, %v984_v9 }
  0xe2   : > { %v989_v46 = vor.u32 %v988_v17, %v987_v16  ;;  %v992_v48 = vor.u32 %v991_v11, %v990_v21  ;;  %v996_v55 = vshll.u32 %v3422_v44, %v981_v49  ;;  %v997_v56 = vshrl.u32 %v3420_v36, %v982_v62 }
  0xe3   : > { %v995_v54 = vor.u32 %v994_v26, %v993_v22  ;;  %v3941_v57 = vmul.u32.u64.low %v3936_v25, %v1118_v18  ;;  %v3942_v43 = vmul.u32.u64.high %v3936_v25, %v1118_v18, %v3941_v57  ;;  %v910_v5 = vsel %vm896_vm15, %v907_v1, %v909_v2 }
  0xe4   : > { %v3945_v61 = vmul.u32.u64.low %v3936_v25, %v1114_v14  ;;  %v3946_v4 = vmul.u32.u64.high %v3936_v25, %v1114_v14, %v3945_v61  ;;  %v998_v6 = vor.u32 %v997_v56, %v996_v55  ;;  %vm999_vm5 = vcmp.lt.s32.totalorder %v980_v19, 1 }
  0xe5   : > { %vm1002_vm6 = vcmp.lt.s32.totalorder %v980_v19, 4  ;;  %v818_v49 = vsel %vm816_vm1, %v817_v52, %v3815_v51  ;;  %vm1001_vm7 = vcmp.lt.s32.totalorder %v980_v19, 3  ;;  %v1007_v8 = vsel %vm999_vm5, %v986_v40, %v989_v46 }
  0xe6   : > { %v1008_v12 = vsel %vm1002_vm6, %v995_v54, 920167782  ;;  %vm1000_vm11 = vcmp.lt.s32.totalorder %v980_v19, 2  ;;  %v1011_v17 = vsel %vm999_vm5, %v989_v46, %v992_v48  ;;  %v1015_v18 = vshll.u32 %v975_v34, 8 }
  0xe7   : > { %v1009_v14 = vsel %vm1001_vm7, %v992_v48, %v1008_v12  ;;  %v3960_v1 = vmul.u32.u64.low %v3790_v30, %v910_v5  ;;  %v3961_v2 = vmul.u32.u64.high %v3790_v30, %v910_v5, %v3960_v1  ;;  %v1012_v16 = vsel %vm1002_vm6, %v998_v6, 1326507024  ;;  %v3323_v6 = vld [vmem:[%s4779_s4 + $0x10] sm:$0xff]  }
  0xe8   : > { %v1010_v9 = vsel %vm1000_vm11, %v1007_v8, %v1009_v14  ;;  %v1108_v51 = vsel %vm1106_vm13, %v3865_v33, 2102212464  ;;  %v1013_v52 = vsel %vm1001_vm7, %v995_v54, %v1012_v16  ;;  %v814_v22 = vmul.u32 %v3779_v20, %v3800_v39  ;;  %3100 = vmatprep.mubr.msk.bf16.mxu0 %vm1630_vm12, %v3323_v6 }
  0xe9   : > { %v3969_v11 = vmul.u32.u64.low %v1015_v18, %v1010_v9  ;;  %v3970_v21 = vmul.u32.u64.high %v1015_v18, %v1010_v9, %v3969_v11  ;;  %v1087_v26 = vshrl.u32 %v4800_v58, %v3806_v45  ;;  %v1004_v34 = vsel %vm1002_vm6, %v992_v48, 2102212464 }
  0xea   : > { %v1014_v55 = vsel %vm1000_vm11, %v1011_v17, %v1013_v52  ;;  %v983_v56 = vshrl.u32 %v4800_v58, %v982_v62  ;;  %v819_v54 = vadd.s32 %v818_v49, %v814_v22  ;;  %v1109_v20 = vsel %vm1105_vm3, %v3863_v29, %v1108_v51 }
  0xeb   : > { %v3980_v57 = vmul.u32.u64.low %v1015_v18, %v1014_v55  ;;  %v3981_v33 = vmul.u32.u64.high %v1015_v18, %v1014_v55, %v3980_v57  ;;  %v1107_v5 = vsel %vm1103_vm2, %v1087_v26, %v3861_v27  ;;  %v900_v39 = vsel %vm898_vm10, %v3832_v0, 2102212464  ;;  %v3324_v27 = vld [vmem:[%s4779_s4 + $0x18] sm:$0xff]  }
  0xec   : > { %v1129_v45 = vadd.s32 1, %v3946_v4  ;;  %v1003_v62 = vsel %vm999_vm5, %v983_v56, %v986_v40  ;;  %v1005_v48 = vsel %vm1001_vm7, %v989_v46, %v1004_v34  ;;  %v879_v29 = vshrl.u32 %v4800_v58, %v3783_v24  ;;  %3101 = vmatmul.mubr.msk.bf16.gmra.mrb[4].mxu0 %vm1630_vm12, %v3324_v27 }
  0xed   : > { %vm1128_vm10 = vc.u32 %v3942_v43, %v3945_v61  ;;  %v1025_v0 = vadd.s32 1, %v3970_v21  ;;  %v1110_v40 = vsel %vm1104_vm4, %v1107_v5, %v1109_v20  ;;  %v901_v49 = vsel %vm897_vm9, %v3830_v63, %v900_v39 }
  0xee   : > { %v899_v46 = vsel %vm895_vm8, %v879_v29, %v3824_v59  ;;  %v1006_v24 = vsel %vm1000_vm11, %v1003_v62, %v1005_v48  ;;  %vm1024_vm13 = vc.u32 %v3981_v33, %v3969_v11  ;;  %v820_v8 = vadd.s32 536870912, %v819_v54 }
  0xef   : > { %v921_v7 = vadd.s32 1, %v3921_v60  ;;  %v1130_v12 = vsel %vm1128_vm10, %v1129_v45, %v3946_v4  ;;  %vm920_vm14 = vc.u32 %v3961_v2, %v3920_v13  ;;  %v1126_v59 = vmul.u32 %v3936_v25, %v1110_v40 }
  0xf0   : > { %v1026_v14 = vsel %vm1024_vm13, %v1025_v0, %v3970_v21  ;;  %v902_v63 = vsel %vm896_vm15, %v899_v46, %v901_v49  ;;  %v1022_v19 = vmul.u32 %v1015_v18, %v1006_v24  ;;  %v4027_v1 = vshrl.u32 %v820_v8, 30 }
  0xf1   : > { %v1131_v17 = vadd.s32 %v1130_v12, %v1126_v59  ;;  %v922_v9 = vsel %vm920_vm14, %v921_v7, %v3921_v60  ;;  %v918_v51 = vmul.u32 %v3790_v30, %v902_v63  ;;  %vm761_vm1 = vcmp.lt.s32.totalorder %v3745_v15, 0 }
  0xf2   : > { %v1027_v16 = vadd.s32 %v1026_v14, %v1022_v19  ;;  %v822_v22 = vshll.u32 %v4027_v1, 30  ;;  %vm4059_vm2 = vcmp.le.f32.partialorder %v759_v35, 0.7853982  ;;  %vm1073_vm3 = vcmp.lt.s32.totalorder %v3751_v31, 0 }
  0xf3   : > { %v923_v4 = vadd.s32 %v922_v9, %v918_v51  ;;  %v1132_v52 = vadd.s32 536870912, %v1131_v17  ;;  %vm969_vm4 = vcmp.lt.s32.totalorder %v3771_v10, 0  ;;  %vm4075_vm5 = vcmp.le.f32.partialorder %v1071_v32, 0.7853982 }
  0xf4   : > { %v1028_v26 = vadd.s32 536870912, %v1027_v16  ;;  %v823_v21 = vsub.s32 %v819_v54, %v822_v22  ;;  %vm865_vm6 = vcmp.lt.s32.totalorder %v3748_v23, 0  ;;  %vm4088_vm7 = vcmp.le.f32.partialorder %v967_v38, 0.7853982 }
  0xf5   : > { %v924_v25 = vadd.s32 536870912, %v923_v4  ;;  %v4032_v34 = vshrl.u32 %v1132_v52, 30  ;;  %vm864_vm11 = vcmp.le.f32.partialorder %v863_v53, 0.7853982  ;;  %vm851_vm14 = vweird.f32 %v3745_v15 }
  0xf6   : > { %v4034_v28 = vshrl.u32 %v1028_v26, 30  ;;  %v825_v56 = vsub.s32 0, %v823_v21 }
  0xf7   : > { %v4036_v18 = vshrl.u32 %v924_v25, 30  ;;  %v1134_v55 = vshll.u32 %v4032_v34, 30 }
  0xf8   : > { %v1030_v60 = vshll.u32 %v4034_v28, 30  ;;  %v2934_v5 = vmin.u32 %v825_v56, %v823_v21 }
  0xf9   : > { %v926_v30 = vshll.u32 %v4036_v18, 30  ;;  %v1135_v57 = vsub.s32 %v1131_v17, %v1134_v55 }
  0xfa   : > { %v1031_v20 = vsub.s32 %v1027_v16, %v1030_v60  ;;  %v827_v62 = vclz %v2934_v5  ;;  %v815_v16 = vadd.s32 %v3814_v41, %v3796_v37  ;;  %v1023_v37 = vadd.s32 %v3969_v11, %v3981_v33 }
  0xfb   : > { %v4041_v39 = vsub.s32 %v923_v4, %v926_v30  ;;  %v1137_v45 = vsub.s32 0, %v1135_v57 }
  0xfc   : > { %v1033_v48 = vsub.s32 0, %v1031_v20  ;;  %v2935_v27 = vadd.s32 4294967294, %v827_v62 }
  0xfd   : > { %v929_v54 = vsub.s32 0, %v4041_v39  ;;  %v2946_v6 = vmin.u32 %v1137_v45, %v1135_v57 }
  0xfe   : > { %v2942_v29 = vmin.u32 %v1033_v48, %v1031_v20  ;;  %vm2936_vm8 = vcmp.lt.s32.totalorder %v2935_v27, 0  ;;  %v1127_v48 = vadd.s32 %v3945_v61, %v3942_v43 }
  0xff   : > { %v2938_v0 = vmin.u32 %v929_v54, %v4041_v39  ;;  %v1139_v40 = vclz %v2946_v6  ;;  %v830_v49 = vsel %vm2936_vm8, 0, %v2935_v27 }
 0x100   : > { %v1035_v46 = vclz %v2942_v29  ;;  %v835_v12 = vsub.s32 4294967266, %v830_v49  ;;  %v831_v17 = vsub.s32 32, %v830_v49  ;;  %v832_v55 = vshll.u32 %v823_v21, %v830_v49 }
 0x101   : > { %v931_v24 = vclz %v2938_v0  ;;  %v2947_v8 = vadd.s32 4294967294, %v1139_v40  ;;  %v919_v21 = vadd.s32 %v3920_v13, %v3961_v2 }
 0x102   : > { %v2943_v7 = vadd.s32 4294967294, %v1035_v46  ;;  %v836_v14 = vadd.s32 127, %v835_v12  ;;  %v833_v22 = vshrl.u32 %v815_v16, %v831_v17 }
 0x103   : > { %v2939_v59 = vadd.s32 4294967294, %v931_v24  ;;  %vm2948_vm9 = vcmp.lt.s32.totalorder %v2947_v8, 0 }
 0x104   : > { %vm2944_vm12 = vcmp.lt.s32.totalorder %v2943_v7, 0  ;;  %v1142_v63 = vsel %vm2948_vm9, 0, %v2947_v8  ;;  %v837_v51 = vshll.u32 %v836_v14, 23  ;;  %v834_v5 = vor.u32 %v833_v22, %v832_v55 }
 0x105   : > { %vm2940_vm15 = vcmp.lt.s32.totalorder %v2939_v59, 0  ;;  %v1038_v19 = vsel %vm2944_vm12, 0, %v2943_v7  ;;  %v1147_v9 = vsub.s32 4294967266, %v1142_v63  ;;  %v1143_v30 = vsub.s32 32, %v1142_v63 }
 0x106   : > { %v934_v4 = vsel %vm2940_vm15, 0, %v2939_v59  ;;  %v1043_v52 = vsub.s32 4294967266, %v1038_v19  ;;  %v838_v56 = vor.u32 4788187, %v837_v51  ;;  %v1039_v45 = vsub.s32 32, %v1038_v19 }
 0x107   : > { %v939_v26 = vsub.s32 4294967266, %v934_v4  ;;  %v1148_v25 = vadd.s32 127, %v1147_v9  ;;  %v935_v27 = vsub.s32 32, %v934_v4  ;;  %v1145_v29 = vshrl.u32 %v1127_v48, %v1143_v30 }
 0x108   : > { %v1044_v60 = vadd.s32 127, %v1043_v52  ;;  %v839_v6 = vand.u32 2147483647, %v838_v56  ;;  %v841_v0 = vcvt.s32.f32 %v834_v5  ;;  %v1041_v40 = vshrl.u32 %v1023_v37, %v1039_v45 }
 0x109   : > { %v940_v62 = vadd.s32 127, %v939_v26  ;;  %v1149_v54 = vshll.u32 %v1148_v25, 23  ;;  %v1144_v49 = vshll.u32 %v1135_v57, %v1142_v63  ;;  %v1040_v7 = vshll.u32 %v1031_v20, %v1038_v19 }
 0x10a   : > { %v1045_v41 = vshll.u32 %v1044_v60, 23  ;;  %v842_v8 = vmul.f32 %v841_v0, %v839_v6  ;;  %v937_v43 = vshrl.u32 %v919_v21, %v935_v27  ;;  %v936_v14 = vshll.u32 %v4041_v39, %v934_v4 }
 0x10b   : > { %v941_v46 = vshll.u32 %v940_v62, 23  ;;  %v1150_v24 = vor.u32 4788187, %v1149_v54  ;;  %v1146_v61 = vor.u32 %v1145_v29, %v1144_v49  ;;  %v1042_v59 = vor.u32 %v1041_v40, %v1040_v7 }
 0x10c   : > { %v1046_v12 = vor.u32 4788187, %v1045_v41  ;;  %v843_v17 = vxor.u32 2147483648, %v842_v8  ;;  %v938_v16 = vor.u32 %v937_v43, %v936_v14  ;;  %v845_v25 = vsub.s32 4, %v4027_v1 }
 0x10d   : > { %v942_v11 = vor.u32 4788187, %v941_v46  ;;  %v1151_v33 = vand.u32 2147483647, %v1150_v24  ;;  %v1153_v51 = vcvt.s32.f32 %v1146_v61  ;;  %v1049_v52 = vcvt.s32.f32 %v1042_v59 }
 0x10e   : > { %v1047_v9 = vand.u32 2147483647, %v1046_v12  ;;  %v844_v57 = vsel %vm761_vm1, %v843_v17, %v842_v8  ;;  %v945_v63 = vcvt.s32.f32 %v938_v16  ;;  %v846_v30 = vsel %vm761_vm1, %v845_v25, %v4027_v1 }
 0x10f   : > { %v943_v13 = vand.u32 2147483647, %v942_v11  ;;  %v1154_v2 = vmul.f32 %v1153_v51, %v1151_v33  ;;  %v847_v22 = vsel %vm4059_vm2, %v3745_v15, %v844_v57  ;;  %v949_v48 = vsub.s32 4, %v4036_v18 }
 0x110   : > { %v1050_v20 = vmul.f32 %v1049_v52, %v1047_v9  ;;  %3356 = vcosq.f32 %v847_v22  ;;  %v848_v1 = vsel %vm4059_vm2, 0, %v846_v30  ;;  %v1053_v46 = vsub.s32 4, %v4034_v28 }
 0x111   : > { %v946_v19 = vmul.f32 %v945_v63, %v943_v13  ;;  %v1155_v4 = vxor.u32 2147483648, %v1154_v2  ;;  %3358 = vsinq.f32 %v847_v22  ;;  %v852_v54 = vadd.s32 3, %v848_v1  ;;  %v1826_v1 = vpop.permute.xlu1 %1825 }
 0x112   : > { %v1051_v26 = vxor.u32 2147483648, %v1050_v20  ;;  %v950_v6 = vsel %vm865_vm6, %v949_v48, %v4036_v18  ;;  %v1054_v49 = vsel %vm969_vm4, %v1053_v46, %v4034_v28  ;;  %v1157_v12 = vsub.s32 4, %v4032_v34  ;;  %v3325_v28 = vld [vmem:[%s4778_s3] sm:$0xff]  }
 0x113   : > { %v947_v55 = vxor.u32 2147483648, %v946_v19  ;;  %v1156_v56 = vsel %vm1073_vm3, %v1155_v4, %v1154_v2  ;;  %v952_v27 = vsel %vm864_vm11, 0, %v950_v6  ;;  %v853_v29 = vand.u32 3, %v852_v54  ;;  %v3329_v48 = vld [vmem:[%s4781_s6] sm:$0xff]  }
 0x114   : > { %v1052_v35 = vsel %vm969_vm4, %v1051_v26, %v1050_v20  ;;  %v1159_v5 = vsel %vm4075_vm5, %v3751_v31, %v1156_v56  ;;  %v956_v21 = vadd.s32 3, %v952_v27  ;;  %v1056_v7 = vsel %vm4088_vm7, 0, %v1054_v49 }
 0x115   : > { %v948_v32 = vsel %vm865_vm6, %v947_v55, %v946_v19  ;;  %v1055_v62 = vsel %vm4088_vm7, %v3771_v10, %v1052_v35  ;;  %3360 = vcosq.f32 %v1159_v5  ;;  %vm855_vm10 = vcmp.eq.s32.totalorder %v853_v29, 0  ;;  %v1836_v54 = vpop.permute.xlu1 %1835 }
 0x116   : > { %3362 = vsinq.f32 %v1055_v62  ;;  %v951_v38 = vsel %vm864_vm11, %v3748_v23, %v948_v32  ;;  %vm858_vm13 = vcmp.eq.s32.totalorder %v853_v29, 2  ;;  %v957_v61 = vand.u32 3, %v956_v21 }
 0x117   : > { %3364 = vcosq.f32 %v1055_v62  ;;  %vm854_vm8 = vcmp.lt.s32.totalorder %v853_v29, 2  ;;  %v1060_v14 = vadd.s32 3, %v1056_v7  ;;  %v1158_v11 = vsel %vm1073_vm3, %v1157_v12, %v4032_v34 }
 0x118   : > { %3366 = vsinq.f32 %v1159_v5  ;;  %vm955_vm9 = vweird.f32 %v3748_v23  ;;  %v1160_v16 = vsel %vm4075_vm5, 0, %v1158_v11  ;;  %vm958_vm12 = vcmp.lt.s32.totalorder %v957_v61, 2  ;;  %v3326_v23 = vld [vmem:[%s4778_s3 + $0x8] sm:$0xff]  }
 0x119   : > { %3368 = vcosq.f32 %v951_v38  ;;  %v1061_v13 = vand.u32 3, %v1060_v14  ;;  %v1164_v57 = vadd.s32 3, %v1160_v16  ;;  %vm962_vm15 = vcmp.eq.s32.totalorder %v957_v61, 2 }
 0x11a   : > { %v3357_v37 = vpop.eup %3356  ;;  %3370 = vsinq.f32 %v951_v38  ;;  %vm4804_vm1 = vcmask 261120   ;;  %vm959_vm2 = vcmp.eq.s32.totalorder %v957_v61, 0  ;;  %vm1059_vm6 = vweird.f32 %v3771_v10  ;;  %v3327_v10 = vld [vmem:[%s4778_s3 + $0x10] sm:$0xff]   ;;  %v1821_v38 = vpop.permute.xlu0 %1820 }
 0x11b   : > { %v3359_v41 = vpop.eup %3358  ;;  %v859_v40 = vxor.u32 2147483648, %v3357_v37  ;;  %vm1063_vm3 = vcmp.eq.s32.totalorder %v1061_v13, 0  ;;  %3108 = vmatprep.mubr.msk.bf16.mxu0 %vm4804_vm1, %v3325_v28  ;;  %vm1066_vm4 = vcmp.eq.s32.totalorder %v1061_v13, 2  ;;  %vm1062_vm5 = vcmp.lt.s32.totalorder %v1061_v13, 2 }
 0x11c   : > { %v856_v0 = vxor.u32 2147483648, %v3359_v41  ;;  %v1165_v25 = vand.u32 3, %v1164_v57 }
 0x11d   : > { %v860_v8 = vsel %vm858_vm13, %v859_v40, %v3359_v41  ;;  %vm1163_vm13 = vweird.f32 %v3751_v31  ;;  %v3328_v31 = vld [vmem:[%s4778_s3 + $0x18] sm:$0xff]   ;;  %v1846_v41 = vpop.permute.xlu1 %1845 }
 0x11e   : > { %v857_v24 = vsel %vm855_vm10, %v3357_v37, %v856_v0  ;;  %vm1167_vm7 = vcmp.eq.s32.totalorder %v1165_v25, 0  ;;  %vm1170_vm11 = vcmp.eq.s32.totalorder %v1165_v25, 2  ;;  %vm1166_vm10 = vcmp.lt.s32.totalorder %v1165_v25, 2  ;;  %v1831_v6 = vpop.permute.xlu0 %1830 }
 0x11f   : > { %v3361_v53 = vpop.eup %3360  ;;  %v861_v17 = vsel %vm854_vm8, %v857_v24, %v860_v8 }
 0x120   : > { %v3363_v18 = vpop.eup %3362  ;;  %v1171_v4 = vxor.u32 2147483648, %v3361_v53  ;;  %v862_v55 = vsel %vm851_vm14, nan, %v861_v17  ;;  %vm4805_vm14 = vcmask 523264  }
 0x121   : > { %v3365_v43 = vpop.eup %3364  ;;  %v1064_v9 = vxor.u32 2147483648, %v3363_v18  ;;  %3124 = vmatprep.mubr.msk.bf16.mxu1 %vm4805_vm14, %v3329_v48  ;;  %v1856_v12 = vpop.permute.xlu1 %1855  ;;  %v3394_v48 = vld [vmem:[%s3692_s26] sm:$0xff] }
 0x122   : > { %v3367_v59 = vpop.eup %3366  ;;  %v1067_v2 = vxor.u32 2147483648, %v3365_v43  ;;  %v1841_v0 = vpop.permute.xlu0 %1840 }
 0x123   : > { %v3369_v33 = vpop.eup %3368  ;;  %v1168_v63 = vxor.u32 2147483648, %v3367_v59  ;;  %v1065_v19 = vsel %vm1063_vm3, %v3365_v43, %v1064_v9  ;;  %v1172_v45 = vsel %vm1170_vm11, %v1171_v4, %v3367_v59  ;;  %v3330_v4 = vld [vmem:[%s4781_s6 + $0x8] sm:$0xff]  }
 0x124   : > { %v3371_v51 = vpop.eup %3370  ;;  %v963_v52 = vxor.u32 2147483648, %v3369_v33  ;;  %v1068_v26 = vsel %vm1066_vm4, %v1067_v2, %v3363_v18 }
 0x125   : > { %v960_v20 = vxor.u32 2147483648, %v3371_v51  ;;  %v1069_v35 = vsel %vm1062_vm5, %v1065_v19, %v1068_v26  ;;  %v1169_v5 = vsel %vm1167_vm7, %v3361_v53, %v1168_v63  ;;  %v3331_v26 = vld [vmem:[%s4781_s6 + $0x10] sm:$0xff]  }
 0x126   : > { %v964_v34 = vsel %vm962_vm15, %v963_v52, %v3371_v51  ;;  %v1070_v30 = vsel %vm1059_vm6, nan, %v1069_v35  ;;  %v1173_v32 = vsel %vm1166_vm10, %v1169_v5, %v1172_v45  ;;  %v1851_v61 = vpop.permute.xlu0 %1850  ;;  %v4142_v52 = vpop.permute.xlu1 %1901 }
 0x127   : > { %v961_v39 = vsel %vm959_vm2, %v3369_v33, %v960_v20  ;;  %v1174_v15 = vsel %vm1163_vm13, nan, %v1173_v32 }
 0x128   : > { %v965_v22 = vsel %vm958_vm12, %v961_v39, %v964_v34  ;;  %v1600_v62 = vpack.c.bf16 %v1174_v15, %v1070_v30 }
 0x129   : > { %v966_v56 = vsel %vm955_vm9, nan, %v965_v22 }
 0x12a   : > { %v1599_v60 = vpack.c.bf16 %v966_v56, %v862_v55  ;;  %v4144_v39 = vpop.permute.xlu0 %1896  ;;  %v4146_v19 = vpop.permute.xlu1 %1911  ;;  %v3332_v56 = vld [vmem:[%s4781_s6 + $0x18] sm:$0xff]  }
 0x12c   : > { %3104 = vmatprep.subr.bf16.mxu0 %v1599_v60 }
 0x12d   : > { %3105 = vmatpush3.bf16.msra.mxu0 %v1599_v60 }
 0x12e   : > { %3106 = vmatprep.subr.bf16.mxu0 %v1600_v62  ;;  %v4151_v22 = vpop.permute.xlu0 %1906  ;;  %v4156_v25 = vpop.permute.xlu1 %1921 }
 0x131   : > { %3107 = vmatpush3.bf16.msra.mxu0 %v1600_v62 }
 0x132   : > { %v4160_v55 = vpop.permute.xlu0 %1916  ;;  %v4165_v35 = vpop.permute.xlu1 %1931 }
 0x134   : > { %3109 = vmatmul.mubr.msk.bf16.vlgmr.msra.gmra.mrb[0].mxu0 %vm4804_vm1, %v3326_v23 }
 0x135   : > { %3112 = vmatprep.mubr.msk.bf16.mxu0 %vm4804_vm1, %v3327_v10 }
 0x136   : > { %v4168_v60 = vpop.permute.xlu0 %1926  ;;  %v4170_v30 = vpop.permute.xlu1 %2067 }
 0x137   : > { %4821 = vst [vmem:[#allocation6_spill] sm:$0xff] %v4170_v30 }
 0x13a   : > { %v4172_v5 = vpop.permute.xlu0 %2062  ;;  %v4174_v45 = vpop.permute.xlu1 %2077 }
 0x13b   : > { %4822 = vst [vmem:[#allocation7_spill] sm:$0xff] %v4172_v5  ;;  %4823 = vst [vmem:[#allocation8_spill] sm:$0xff] %v4174_v45  ;;  %v3333_v5 = vld [vmem:[%s4783_s8] sm:$0xff]  }
 0x13c   : > { %3113 = vmatmul.mubr.msk.bf16.gmra.mrb[4].mxu0 %vm4804_vm1, %v3328_v31 }
 0x13e   : > { %v4176_v32 = vpop.permute.xlu0 %2072  ;;  %v4178_v15 = vpop.permute.xlu1 %2087 }
 0x13f   : > { %4824 = vst [vmem:[#allocation9_spill] sm:$0xff] %v4178_v15 }
 0x142   : > { %v4180_v62 = vpop.permute.xlu0 %2082  ;;  %v4182_v23 = vpop.permute.xlu1 %2097 }
 0x143   : > { %4825 = vst [vmem:[#allocation10_spill] sm:$0xff] %v4180_v62  ;;  %4826 = vst [vmem:[#allocation11_spill] sm:$0xff] %v4182_v23 }
 0x146   : > { %v4184_v10 = vpop.permute.xlu0 %2092  ;;  %v683_v31 = vpop.permute.xlu1 %682 }
 0x147   : > { %4827 = vst [vmem:[#allocation12_spill] sm:$0xff] %v4184_v10 }
 0x207   : > { %v3110_v37 = vpop.f32.mrb[0].mxu0 }
 0x208   : > { %v1860_v27 = vadd.f32 %v3110_v37, %v1831_v6  ;;  %v1779_v29 = vpop.f32.mrb[1].mxu0  ;;  %v739_v6 = vpop.permute.xlu1 %738 }
 0x209   : > { %v1858_v40 = vadd.f32 %v1821_v38, %v1779_v29  ;;  %v3111_v21 = vpop.f32.mrb[2].mxu0 }
 0x20a   : > { %v1861_v46 = vadd.f32 %v3111_v21, %v1836_v54  ;;  %v1782_v53 = vpop.f32.mrb[3].mxu0  ;;  %v1868_v18 = vmax.f32 %v1860_v27, 0.0  ;;  %v678_v54 = vpop.permute.xlu0 %677 }
 0x20b   : > { %v1859_v49 = vadd.f32 %v1826_v1, %v1782_v53  ;;  %v1866_v8 = vmax.f32 %v1858_v40, 0.0  ;;  %v638_v1 = vrot.slane %v3394_v48, 4  ;;  %v618_v53 = vld [vmem:[%s3692_s26 + $0x8] sm:$0xff] }
 0x20c   : > { %v1869_v24 = vmax.f32 %v1861_v46, 0.0 }
 0x20d   : > { %v1867_v7 = vmax.f32 %v1859_v49, 0.0  ;;  %v645_v38 = vsel %vm4803_vm0, %v638_v1, %v3394_v48 }
 0x20e   : > { %v1883_v43 = vpack.c.bf16 %v1869_v24, %v1868_v18  ;;  %v700_v37 = vmul.f32 %v683_v31, %v645_v38  ;;  %v734_v27 = vpop.permute.xlu0 %733  ;;  %v699_v29 = vmul.f32 %v678_v54, %v645_v38  ;;  %v693_v24 = vpop.permute.xlu1 %692 }
 0x20f   : > { %v3114_v59 = vpop.f32.mrb[4].mxu0  ;;  %v1882_v14 = vpack.c.bf16 %v1867_v7, %v1866_v8  ;;  %v641_v8 = vrot.slane %v618_v53, 4 }
 0x210   : > { %v1864_v11 = vadd.f32 %v3114_v59, %v1851_v61  ;;  %v1795_v28 = vpop.f32.mrb[5].mxu0  ;;  %v4191_v40 = vadd.f32 %v734_v27, %v699_v29 }
 0x211   : > { %v1862_v33 = vadd.f32 %v1841_v0, %v1795_v28  ;;  %v3115_v17 = vpop.f32.mrb[6].mxu0  ;;  %3116 = vmatprep.subr.bf16.mxu1 %v1882_v14  ;;  %v646_v61 = vsel %vm4803_vm0, %v618_v53, %v641_v8 }
 0x212   : > { %v1865_v9 = vadd.f32 %v3115_v17, %v1856_v12  ;;  %v1798_v16 = vpop.f32.mrb[7].mxu0  ;;  %3117 = vmatpush3.bf16.msra.mxu1 %v1882_v14  ;;  %v1872_v13 = vmax.f32 %v1864_v11, 0.0  ;;  %v1178_v46 = vand.u32 2139095040, %v4191_v40  ;;  %v688_v7 = vpop.permute.xlu0 %687  ;;  %v702_v14 = vmul.f32 %v693_v24, %v646_v61 }
 0x213   : > { %v1863_v51 = vadd.f32 %v1846_v41, %v1798_v16  ;;  %3118 = vmatprep.subr.bf16.mxu1 %v1883_v43  ;;  %v1870_v57 = vmax.f32 %v1862_v33, 0.0  ;;  %v4188_v41 = vadd.f32 %v739_v6, %v700_v37  ;;  %v749_v59 = vpop.permute.xlu1 %748  ;;  %v701_v17 = vmul.f32 %v688_v7, %v646_v61 }
 0x214   : > { %v1873_v2 = vmax.f32 %v1865_v9, 0.0  ;;  %v1179_v18 = vshrl.u32 %v1178_v46, 23  ;;  %v4196_v28 = vadd.f32 %v749_v59, %v702_v14 }
 0x215   : > { %v1871_v20 = vmax.f32 %v1863_v51, 0.0  ;;  %v1282_v0 = vand.u32 2139095040, %v4188_v41 }
 0x216   : > { %v1885_v34 = vpack.c.bf16 %v1873_v2, %v1872_v13  ;;  %3119 = vmatpush3.bf16.msra.mxu1 %v1883_v43  ;;  %v2949_v43 = vadd.s32 4294967169, %v1179_v18  ;;  %v744_v33 = vpop.permute.xlu0 %743  ;;  %v1490_v51 = vand.u32 2139095040, %v4196_v28  ;;  %v4798_v2 = vand.u32 2147483647, %v4188_v41 }
 0x217   : > { %v1884_v63 = vpack.c.bf16 %v1871_v20, %v1870_v57  ;;  %v1283_v21 = vshrl.u32 %v1282_v0, 23  ;;  %v4198_v16 = vadd.f32 %v744_v33, %v701_v17 }
 0x218   : > { %v1185_v11 = vadd.s32 1, %v2949_v43 }
 0x219   : > { %3120 = vmatprep.subr.bf16.mxu1 %v1884_v63  ;;  %v2953_v49 = vadd.s32 4294967169, %v1283_v21  ;;  %v1386_v20 = vand.u32 2139095040, %v4198_v16 }
 0x21a   : > { %3121 = vmatpush3.bf16.msra.mxu1 %v1884_v63  ;;  %vm1186_vm9 = vcmp.gt.s32.totalorder %v1185_v11, 0 }
 0x21b   : > { %3122 = vmatprep.subr.bf16.mxu1 %v1885_v34  ;;  %v1289_v12 = vadd.s32 1, %v2953_v49  ;;  %v1187_v57 = vsel %vm1186_vm9, %v1185_v11, 0  ;;  %v1387_v31 = vshrl.u32 %v1386_v20, 23 }
 0x21c   : > { %v4239_v33 = vshrl.u32 %v1187_v57, 5 }
 0x21d   : > { %vm1290_vm8 = vcmp.gt.s32.totalorder %v1289_v12, 0  ;;  %v2957_v46 = vadd.s32 4294967169, %v1387_v31 }
 0x21e   : > { %3123 = vmatpush3.bf16.msra.mxu1 %v1885_v34  ;;  %v1291_v9 = vsel %vm1290_vm8, %v1289_v12, 0  ;;  %v1491_v34 = vshrl.u32 %v1490_v51, 23  ;;  %vm1210_vm4 = vcmp.lt.s32.totalorder %v4239_v33, 4  ;;  %vm1207_vm6 = vcmp.lt.s32.totalorder %v4239_v33, 1 }
 0x21f   : > { %v1293_v13 = vand.u32 31, %v1291_v9  ;;  %v4218_v29 = vshrl.u32 %v1291_v9, 5  ;;  %v1393_v51 = vadd.s32 1, %v2957_v46  ;;  %vm1209_vm7 = vcmp.lt.s32.totalorder %v4239_v33, 3 }
 0x220   : > { %v2961_v48 = vadd.s32 4294967169, %v1491_v34  ;;  %vm1208_vm10 = vcmp.lt.s32.totalorder %v4239_v33, 2 }
 0x221   : > { %3125 = vmatmul.mubr.msk.bf16.vlgmr.msra.gmra.mrb[0].mxu1 %vm4805_vm14, %v3330_v4  ;;  %v4203_v63 = vsub.s32 32, %v1293_v13  ;;  %v1189_v4 = vand.u32 31, %v1187_v57  ;;  %v1296_v0 = vshll.u32 %v4800_v58, %v1293_v13  ;;  %v1299_v53 = vshll.u32 %v3424_v50, %v1293_v13 }
 0x222   : > { %3128 = vmatprep.mubr.msk.bf16.mxu1 %vm4805_vm14, %v3331_v26  ;;  %v1286_v26 = vand.u32 8388607, %v4798_v2  ;;  %v1305_v49 = vshll.u32 %v3423_v47, %v1293_v13  ;;  %v1308_v18 = vshll.u32 %v3422_v44, %v1293_v13  ;;  %v1497_v24 = vadd.s32 1, %v2961_v48 }
 0x223   : > { %v1297_v1 = vshrl.u32 %v3424_v50, %v4203_v63  ;;  %v4210_v38 = vsub.s32 32, %v1189_v4  ;;  %v1300_v6 = vshrl.u32 %v3421_v42, %v4203_v63  ;;  %v1306_v37 = vshrl.u32 %v3422_v44, %v4203_v63 }
 0x224   : > { %v1287_v54 = vor.u32 8388608, %v1286_v26  ;;  %v1309_v27 = vshrl.u32 %v3420_v36, %v4203_v63  ;;  %v1302_v7 = vshll.u32 %v3421_v42, %v1293_v13  ;;  %v1303_v12 = vshrl.u32 %v3423_v47, %v4203_v63 }
 0x225   : > { %v4228_v8 = vor.u32 %v1297_v1, %v1296_v0  ;;  %v1202_v43 = vshrl.u32 %v3422_v44, %v4210_v38  ;;  %v4235_v61 = vor.u32 %v1300_v6, %v1299_v53  ;;  %v1307_v59 = vor.u32 %v1306_v37, %v1305_v49 }
 0x226   : > { %v1310_v14 = vor.u32 %v1309_v27, %v1308_v18  ;;  %v1205_v11 = vshrl.u32 %v3420_v36, %v4210_v38  ;;  %v1193_v17 = vshrl.u32 %v3424_v50, %v4210_v38  ;;  %v1201_v9 = vshll.u32 %v3423_v47, %v1189_v4 }
 0x227   : > { %v1196_v13 = vshrl.u32 %v3421_v42, %v4210_v38  ;;  %v1199_v20 = vshrl.u32 %v3423_v47, %v4210_v38  ;;  %v1204_v34 = vshll.u32 %v3422_v44, %v1189_v4  ;;  %vm1498_vm12 = vcmp.gt.s32.totalorder %v1497_v24, 0 }
 0x228   : > { %v4249_v26 = vor.u32 %v1303_v12, %v1302_v7  ;;  %vm1311_vm15 = vcmp.lt.s32.totalorder %v4218_v29, 1  ;;  %vm1314_vm2 = vcmp.lt.s32.totalorder %v4218_v29, 4  ;;  %v1203_v57 = vor.u32 %v1202_v43, %v1201_v9 }
 0x229   : > { %3129 = vmatmul.mubr.msk.bf16.gmra.mrb[4].mxu1 %vm4805_vm14, %v3332_v56  ;;  %v4799_v56 = vand.u32 2147483647, %v4191_v40  ;;  %v1192_v31 = vshll.u32 %v4800_v58, %v1189_v4  ;;  %v1195_v48 = vshll.u32 %v3424_v50, %v1189_v4  ;;  %v1198_v1 = vshll.u32 %v3421_v42, %v1189_v4 }
 0x22a   : > { %v1206_v6 = vor.u32 %v1205_v11, %v1204_v34  ;;  %v1320_v37 = vsel %vm1314_vm2, %v1307_v59, 920167782  ;;  %v1324_v27 = vsel %vm1314_vm2, %v1310_v14, 1326507024  ;;  %v1499_v0 = vsel %vm1498_vm12, %v1497_v24, 0  ;;  %3140 = vmatprep.mubr.msk.bf16.mxu1 %vm4805_vm14, %v3333_v5 }
 0x22b   : > { %v4223_v21 = vand.u32 8388607, %v4799_v56  ;;  %vm1394_vm3 = vcmp.gt.s32.totalorder %v1393_v51, 0  ;;  %v4260_v46 = vor.u32 %v1193_v17, %v1192_v31  ;;  %v4262_v53 = vor.u32 %v1196_v13, %v1195_v48 }
 0x22c   : > { %v4264_v49 = vor.u32 %v1199_v20, %v1198_v1  ;;  %vm1313_vm5 = vcmp.lt.s32.totalorder %v4218_v29, 3  ;;  %v1319_v4 = vsel %vm1311_vm15, %v4228_v8, %v4235_v61  ;;  %v4272_v18 = vshll.u32 %v1287_v54, 8 }
 0x22d   : > { %v1216_v24 = vsel %vm1210_vm4, %v1203_v57, 920167782  ;;  %v1321_v7 = vsel %vm1313_vm5, %v4249_v26, %v1320_v37  ;;  %v1220_v12 = vsel %vm1210_vm4, %v1206_v6, 1326507024  ;;  %v1501_v43 = vand.u32 31, %v1499_v0 }
 0x22e   : > { %v1395_v14 = vsel %vm1394_vm3, %v1393_v51, 0  ;;  %v1323_v11 = vsel %vm1311_vm15, %v4235_v61, %v4249_v26  ;;  %v1325_v54 = vsel %vm1313_vm5, %v1307_v59, %v1324_v27  ;;  %vm1312_vm11 = vcmp.lt.s32.totalorder %v4218_v29, 2 }
 0x22f   : > { %v1183_v17 = vor.u32 8388608, %v4223_v21  ;;  %v1215_v9 = vsel %vm1207_vm6, %v4260_v46, %v4262_v53  ;;  %v1217_v51 = vsel %vm1209_vm7, %v4264_v49, %v1216_v24  ;;  %v4300_v59 = vsel %vm1312_vm11, %v1319_v4, %v1321_v7 }
 0x230   : > { %v1219_v13 = vsel %vm1207_vm6, %v4262_v53, %v4264_v49  ;;  %v1221_v21 = vsel %vm1209_vm7, %v1203_v57, %v1220_v12  ;;  %v1397_v20 = vand.u32 31, %v1395_v14  ;;  %v4310_v34 = vsel %vm1312_vm11, %v1323_v11, %v1325_v54 }
 0x231   : > { %v4797_v31 = vand.u32 2147483647, %v4196_v28  ;;  %v4314_v48 = vsub.s32 32, %v1501_v43  ;;  %v4318_v1 = vsel %vm1208_vm10, %v1215_v9, %v1217_v51  ;;  %v4328_v57 = vsel %vm1208_vm10, %v1219_v13, %v1221_v21 }
 0x232   : > { %v4322_v6 = vmul.u32.u64.low %v4272_v18, %v4300_v59  ;;  %v4323_v37 = vmul.u32.u64.high %v4272_v18, %v4300_v59, %v4322_v6  ;;  %v4330_v27 = vshll.u32 %v1183_v17, 8  ;;  %v4338_v7 = vsub.s32 32, %v1397_v20 }
 0x233   : > { %v4334_v4 = vmul.u32.u64.low %v4272_v18, %v4310_v34  ;;  %v4335_v24 = vmul.u32.u64.high %v4272_v18, %v4310_v34, %v4334_v4  ;;  %v4348_v54 = vand.u32 8388607, %v4797_v31  ;;  %v1505_v17 = vshrl.u32 %v3424_v50, %v4314_v48 }
 0x234   : > { %v4342_v12 = vmul.u32.u64.low %v4330_v27, %v4318_v1  ;;  %v4343_v11 = vmul.u32.u64.high %v4330_v27, %v4318_v1, %v4342_v12  ;;  %v4354_v9 = vmul.u32.u64.low %v4330_v27, %v4328_v57  ;;  %v4355_v51 = vmul.u32.u64.high %v4330_v27, %v4328_v57, %v4354_v9 }
 0x235   : > { %v1514_v59 = vshrl.u32 %v3422_v44, %v4314_v48  ;;  %v1517_v13 = vshrl.u32 %v3420_v36, %v4314_v48  ;;  %v4362_v21 = vshrl.u32 %v1499_v0, 5  ;;  %v1504_v34 = vshll.u32 %v4800_v58, %v1501_v43 }
 0x236   : > { %v1513_v1 = vshll.u32 %v3423_v47, %v1501_v43  ;;  %v1508_v31 = vshrl.u32 %v3421_v42, %v4314_v48  ;;  %v1511_v57 = vshrl.u32 %v3423_v47, %v4314_v48  ;;  %v1516_v9 = vshll.u32 %v3422_v44, %v1501_v43 }
 0x237   : > { %v1410_v2 = vshrl.u32 %v3422_v44, %v4338_v7  ;;  %v4374_v56 = vor.u32 %v1505_v17, %v1504_v34  ;;  %v1507_v0 = vshll.u32 %v3424_v50, %v1501_v43  ;;  %v1510_v58 = vshll.u32 %v3421_v42, %v1501_v43 }
 0x238   : > { %v1413_v4 = vshrl.u32 %v3420_v36, %v4338_v7  ;;  %v1515_v3 = vor.u32 %v1514_v59, %v1513_v1  ;;  %v1518_v15 = vor.u32 %v1517_v13, %v1516_v9  ;;  %v4380_v23 = vshrl.u32 %v1395_v14, 5 }
 0x239   : > { %v1409_v62 = vshll.u32 %v3423_v47, %v1397_v20  ;;  %v1401_v10 = vshrl.u32 %v3424_v50, %v4338_v7  ;;  %v1404_v17 = vshrl.u32 %v3421_v42, %v4338_v7  ;;  %v1407_v34 = vshrl.u32 %v3423_v47, %v4338_v7 }
 0x23a   : > { %v1412_v43 = vshll.u32 %v3422_v44, %v1397_v20  ;;  %v4390_v30 = vor.u32 %v1508_v31, %v1507_v0  ;;  %v1512_v36 = vor.u32 %v1511_v57, %v1510_v58  ;;  %vm1522_vm13 = vcmp.lt.s32.totalorder %v4362_v21, 4 }
 0x23b   : > { %v1411_v14 = vor.u32 %v1410_v2, %v1409_v62  ;;  %v4828_v59 = vmov 683565275   ;;  %v1403_v1 = vshll.u32 %v3424_v50, %v1397_v20  ;;  %v1406_v9 = vshll.u32 %v3421_v42, %v1397_v20 }
 0x23c   : > { %v1400_v13 = vshll.u32 %v4828_v59, %v1397_v20  ;;  %v1414_v45 = vor.u32 %v1413_v4, %v1412_v43  ;;  %v1528_v44 = vsel %vm1522_vm13, %v1515_v3, 920167782  ;;  %v1532_v47 = vsel %vm1522_vm13, %v1518_v15, 1326507024 }
 0x23d   : > { %v4829_v58 = vand.u32 2147483647, %v4198_v16  ;;  %v4407_v31 = vor.u32 %v1404_v17, %v1403_v1  ;;  %v1408_v50 = vor.u32 %v1407_v34, %v1406_v9  ;;  %vm1418_vm8 = vcmp.lt.s32.totalorder %v4380_v23, 4 }
 0x23e   : > { %v4405_v2 = vor.u32 %v1401_v10, %v1400_v13  ;;  %vm1519_vm9 = vcmp.lt.s32.totalorder %v4362_v21, 1  ;;  %vm1521_vm12 = vcmp.lt.s32.totalorder %v4362_v21, 3  ;;  %v1424_v42 = vsel %vm1418_vm8, %v1411_v14, 920167782 }
 0x23f   : > { %v1390_v62 = vand.u32 8388607, %v4829_v58  ;;  %v1495_v15 = vor.u32 8388608, %v4348_v54  ;;  %v1527_v10 = vsel %vm1519_vm9, %v4374_v56, %v4390_v30  ;;  %v1529_v20 = vsel %vm1521_vm12, %v1512_v36, %v1528_v44 }
 0x240   : > { %v1428_v5 = vsel %vm1418_vm8, %v1414_v45, 1326507024  ;;  %v1531_v4 = vsel %vm1519_vm9, %v4390_v30, %v1512_v36  ;;  %v1533_v57 = vsel %vm1521_vm12, %v1515_v3, %v1532_v47  ;;  %vm1415_vm3 = vcmp.lt.s32.totalorder %v4380_v23, 1 }
 0x241   : > { %vm1417_vm0 = vcmp.lt.s32.totalorder %v4380_v23, 3  ;;  %vm1520_vm1 = vcmp.lt.s32.totalorder %v4362_v21, 2  ;;  %v1391_v54 = vor.u32 8388608, %v1390_v62  ;;  %v1423_v0 = vsel %vm1415_vm3, %v4405_v2, %v4407_v31 }
 0x242   : > { %v1425_v45 = vsel %vm1417_vm0, %v1408_v50, %v1424_v42  ;;  %v1530_v17 = vsel %vm1520_vm1, %v1527_v10, %v1529_v20  ;;  %v1427_v3 = vsel %vm1415_vm3, %v4407_v31, %v1408_v50  ;;  %v1429_v34 = vsel %vm1417_vm0, %v1411_v14, %v1428_v5 }
 0x243   : > { %v1295_v43 = vshrl.u32 %v4828_v59, %v4203_v63  ;;  %v1534_v13 = vsel %vm1520_vm1, %v1531_v4, %v1533_v57  ;;  %v1535_v1 = vshll.u32 %v1495_v15, 8  ;;  %vm1416_vm14 = vcmp.lt.s32.totalorder %v4380_v23, 2 }
 0x244   : > { %v1316_v9 = vsel %vm1314_vm2, %v4249_v26, 2102212464  ;;  %v1191_v44 = vshrl.u32 %v4828_v59, %v4210_v38  ;;  %v1212_v14 = vsel %vm1210_vm4, %v4264_v49, 2102212464  ;;  %v1426_v63 = vsel %vm1416_vm14, %v1423_v0, %v1425_v45 }
 0x245   : > { %v4460_v47 = vmul.u32.u64.low %v1535_v1, %v1530_v17  ;;  %v4461_v58 = vmul.u32.u64.high %v1535_v1, %v1530_v17, %v4460_v47  ;;  %v1430_v62 = vsel %vm1416_vm14, %v1427_v3, %v1429_v34  ;;  %v1431_v42 = vshll.u32 %v1391_v54, 8 }
 0x246   : > { %v1315_v26 = vsel %vm1311_vm15, %v1295_v43, %v4228_v8  ;;  %v4469_v38 = vmul.u32.u64.low %v1535_v1, %v1534_v13  ;;  %v4470_v15 = vmul.u32.u64.high %v1535_v1, %v1534_v13, %v4469_v38  ;;  %v1211_v49 = vsel %vm1207_vm6, %v1191_v44, %v4260_v46 }
 0x247   : > { %v1213_v10 = vsel %vm1209_vm7, %v4262_v53, %v1212_v14  ;;  %v4478_v20 = vmul.u32.u64.low %v1431_v42, %v1426_v63  ;;  %v4479_v5 = vmul.u32.u64.high %v1431_v42, %v1426_v63, %v4478_v20  ;;  %v1317_v4 = vsel %vm1313_vm5, %v4235_v61, %v1316_v9 }
 0x248   : > { %v1233_v8 = vadd.s32 1, %v4343_v11  ;;  %v4486_v57 = vmul.u32.u64.low %v1431_v42, %v1430_v62  ;;  %v4487_v54 = vmul.u32.u64.high %v1431_v42, %v1430_v62, %v4486_v57  ;;  %vm1232_vm15 = vc.u32 %v4355_v51, %v4342_v12 }
 0x249   : > { %v1524_v46 = vsel %vm1522_vm13, %v1512_v36, 2102212464  ;;  %v1337_v53 = vadd.s32 1, %v4323_v37  ;;  %v1214_v0 = vsel %vm1208_vm10, %v1211_v49, %v1213_v10  ;;  %v1503_v45 = vshrl.u32 %v4828_v59, %v4314_v48 }
 0x24a   : > { %v1318_v61 = vsel %vm1312_vm11, %v1315_v26, %v1317_v4  ;;  %vm1336_vm2 = vc.u32 %v4335_v24, %v4322_v6  ;;  %v1420_v17 = vsel %vm1418_vm8, %v1408_v50, 2102212464  ;;  %v1234_v3 = vsel %vm1232_vm15, %v1233_v8, %v4343_v11 }
 0x24b   : > { %v1523_v36 = vsel %vm1519_vm9, %v1503_v45, %v4374_v56  ;;  %v1525_v33 = vsel %vm1521_vm12, %v4390_v30, %v1524_v46  ;;  %v1399_v29 = vshrl.u32 %v4828_v59, %v4338_v7  ;;  %v1230_v48 = vmul.u32 %v4330_v27, %v1214_v0 }
 0x24c   : > { %v1545_v34 = vadd.s32 1, %v4461_v58  ;;  %v1338_v43 = vsel %vm1336_vm2, %v1337_v53, %v4323_v37  ;;  %vm1544_vm4 = vc.u32 %v4470_v15, %v4460_v47  ;;  %v1421_v30 = vsel %vm1417_vm0, %v4407_v31, %v1420_v17 }
 0x24d   : > { %v1419_v56 = vsel %vm1415_vm3, %v1399_v29, %v4405_v2  ;;  %v1334_v11 = vmul.u32 %v4272_v18, %v1318_v61  ;;  %v1235_v7 = vadd.s32 %v1234_v3, %v1230_v48  ;;  %v1526_v27 = vsel %vm1520_vm1, %v1523_v36, %v1525_v33 }
 0x24e   : > { %v1441_v59 = vadd.s32 1, %v4479_v5  ;;  %vm1440_vm5 = vc.u32 %v4487_v54, %v4478_v20  ;;  %v1546_v50 = vsel %vm1544_vm4, %v1545_v34, %v4461_v58  ;;  %v1422_v2 = vsel %vm1416_vm14, %v1419_v56, %v1421_v30 }
 0x24f   : > { %v1339_v37 = vadd.s32 %v1338_v43, %v1334_v11  ;;  %v1542_v13 = vmul.u32 %v1535_v1, %v1526_v27  ;;  %v1236_v9 = vadd.s32 536870912, %v1235_v7  ;;  %v1438_v44 = vmul.u32 %v1431_v42, %v1422_v2 }
 0x250   : > { %v1442_v31 = vsel %vm1440_vm5, %v1441_v59, %v4479_v5  ;;  %vm1177_vm7 = vcmp.lt.s32.totalorder %v4191_v40, 0  ;;  %vm1281_vm11 = vcmp.lt.s32.totalorder %v4188_v41, 0  ;;  %vm1489_vm8 = vcmp.lt.s32.totalorder %v4196_v28, 0 }
 0x251   : > { %v1547_v18 = vadd.s32 %v1546_v50, %v1542_v13  ;;  %v1340_v14 = vadd.s32 536870912, %v1339_v37  ;;  %v1443_v21 = vadd.s32 %v1442_v31, %v1438_v44  ;;  %v4534_v63 = vshrl.u32 %v1236_v9, 30 }
 0x252   : > { %vm1385_vm9 = vcmp.lt.s32.totalorder %v4198_v16, 0 }
 0x253   : > { %v1548_v62 = vadd.s32 536870912, %v1547_v18  ;;  %v4536_v26 = vshrl.u32 %v1340_v14, 30  ;;  %v1444_v38 = vadd.s32 536870912, %v1443_v21  ;;  %v1238_v49 = vshll.u32 %v4534_v63, 30 }
 0x255   : > { %v4539_v58 = vshrl.u32 %v1548_v62, 30  ;;  %v1342_v23 = vshll.u32 %v4536_v26, 30  ;;  %v4542_v1 = vshrl.u32 %v1444_v38, 30  ;;  %v1239_v10 = vsub.s32 %v1235_v7, %v1238_v49 }
 0x256   : > { %v1335_v49 = vadd.s32 %v4322_v6, %v4335_v24 }
 0x257   : > { %v1550_v5 = vshll.u32 %v4539_v58, 30  ;;  %v1343_v42 = vsub.s32 %v1339_v37, %v1342_v23  ;;  %v1446_v4 = vshll.u32 %v4542_v1, 30  ;;  %v1241_v8 = vsub.s32 0, %v1239_v10 }
 0x259   : > { %v1551_v57 = vsub.s32 %v1547_v18, %v1550_v5  ;;  %v1345_v46 = vsub.s32 0, %v1343_v42  ;;  %v4546_v53 = vsub.s32 %v1443_v21, %v1446_v4  ;;  %v2950_v0 = vmin.u32 %v1241_v8, %v1239_v10 }
 0x25a   : > { %v1231_v21 = vadd.s32 %v4342_v12, %v4355_v51 }
 0x25b   : > { %v1553_v45 = vsub.s32 0, %v1551_v57  ;;  %v2954_v61 = vmin.u32 %v1345_v46, %v1343_v42  ;;  %v1449_v17 = vsub.s32 0, %v4546_v53  ;;  %v1243_v3 = vclz %v2950_v0 }
 0x25d   : > { %v2962_v36 = vmin.u32 %v1553_v45, %v1551_v57  ;;  %v1347_v33 = vclz %v2954_v61  ;;  %v2958_v29 = vmin.u32 %v1449_v17, %v4546_v53  ;;  %v2951_v48 = vadd.s32 4294967294, %v1243_v3 }
 0x25e   : > { %v1543_v61 = vadd.s32 %v4460_v47, %v4470_v15 }
 0x25f   : > { %v1555_v34 = vclz %v2962_v36  ;;  %v2955_v43 = vadd.s32 4294967294, %v1347_v33  ;;  %v1451_v56 = vclz %v2958_v29  ;;  %vm2952_vm0 = vcmp.lt.s32.totalorder %v2951_v48, 0 }
 0x260   : > { %v1246_v11 = vsel %vm2952_vm0, 0, %v2951_v48  ;;  %v1439_v29 = vadd.s32 %v4478_v20, %v4487_v54 }
 0x261   : > { %v2963_v30 = vadd.s32 4294967294, %v1555_v34  ;;  %vm2956_vm1 = vcmp.lt.s32.totalorder %v2955_v43, 0  ;;  %v2959_v7 = vadd.s32 4294967294, %v1451_v56  ;;  %v1251_v59 = vsub.s32 4294967266, %v1246_v11 }
 0x262   : > { %v1350_v27 = vsel %vm2956_vm1, 0, %v2955_v43  ;;  %v1247_v18 = vsub.s32 32, %v1246_v11  ;;  %v1248_v0 = vshll.u32 %v1239_v10, %v1246_v11 }
 0x263   : > { %vm2964_vm14 = vcmp.lt.s32.totalorder %v2963_v30, 0  ;;  %vm2960_vm6 = vcmp.lt.s32.totalorder %v2959_v7, 0  ;;  %v1355_v37 = vsub.s32 4294967266, %v1350_v27  ;;  %v1252_v2 = vadd.s32 127, %v1251_v59 }
 0x264   : > { %v1558_v50 = vsel %vm2964_vm14, 0, %v2963_v30  ;;  %v1454_v13 = vsel %vm2960_vm6, 0, %v2959_v7  ;;  %v1351_v14 = vsub.s32 32, %v1350_v27  ;;  %v1249_v5 = vshrl.u32 %v1231_v21, %v1247_v18 }
 0x265   : > { %v1563_v9 = vsub.s32 4294967266, %v1558_v50  ;;  %v1356_v31 = vadd.s32 127, %v1355_v37  ;;  %v1459_v44 = vsub.s32 4294967266, %v1454_v13  ;;  %v1253_v62 = vshll.u32 %v1252_v2, 23 }
 0x266   : > { %v1559_v4 = vsub.s32 32, %v1558_v50  ;;  %v1353_v46 = vshrl.u32 %v1335_v49, %v1351_v14  ;;  %v1455_v3 = vsub.s32 32, %v1454_v13  ;;  %v1352_v36 = vshll.u32 %v1343_v42, %v1350_v27 }
 0x267   : > { %v1564_v38 = vadd.s32 127, %v1563_v9  ;;  %v1357_v23 = vshll.u32 %v1356_v31, 23  ;;  %v1460_v8 = vadd.s32 127, %v1459_v44  ;;  %v1254_v45 = vor.u32 4788187, %v1253_v62 }
 0x268   : > { %v1250_v12 = vor.u32 %v1249_v5, %v1248_v0  ;;  %v1561_v51 = vshrl.u32 %v1543_v61, %v1559_v4  ;;  %v1354_v24 = vor.u32 %v1353_v46, %v1352_v36  ;;  %v1560_v34 = vshll.u32 %v1551_v57, %v1558_v50 }
 0x269   : > { %v1565_v17 = vshll.u32 %v1564_v38, 23  ;;  %v1358_v33 = vor.u32 4788187, %v1357_v23  ;;  %v1461_v6 = vshll.u32 %v1460_v8, 23  ;;  %v1255_v48 = vand.u32 2147483647, %v1254_v45 }
 0x26a   : > { %v1457_v56 = vshrl.u32 %v1439_v29, %v1455_v3  ;;  %v1257_v30 = vcvt.s32.f32 %v1250_v12  ;;  %v1562_v11 = vor.u32 %v1561_v51, %v1560_v34  ;;  %v1456_v47 = vshll.u32 %v4546_v53, %v1454_v13 }
 0x26b   : > { %v1566_v43 = vor.u32 4788187, %v1565_v17  ;;  %v1359_v10 = vand.u32 2147483647, %v1358_v33  ;;  %v1462_v15 = vor.u32 4788187, %v1461_v6  ;;  %v1361_v7 = vcvt.s32.f32 %v1354_v24 }
 0x26c   : > { %v1258_v42 = vmul.f32 %v1257_v30, %v1255_v48  ;;  %v1458_v59 = vor.u32 %v1457_v56, %v1456_v47  ;;  %v1569_v2 = vcvt.s32.f32 %v1562_v11  ;;  %v4830_v44 = vand.u32 2147483647, %v4191_v40 }
 0x26d   : > { %v1567_v27 = vand.u32 2147483647, %v1566_v43  ;;  %v1362_v37 = vmul.f32 %v1361_v7, %v1359_v10  ;;  %v1463_v9 = vand.u32 2147483647, %v1462_v15  ;;  %v4833_v38 = vand.u32 2147483647, %v4188_v41 }
 0x26e   : > { %v1259_v20 = vxor.u32 2147483648, %v1258_v42  ;;  %v1465_v31 = vcvt.s32.f32 %v1458_v59  ;;  %vm4567_vm10 = vcmp.le.f32.partialorder %v4830_v44, 0.7853982  ;;  %v1261_v23 = vsub.s32 4, %v4534_v63 }
 0x26f   : > { %v1570_v54 = vmul.f32 %v1569_v2, %v1567_v27  ;;  %v1363_v18 = vxor.u32 2147483648, %v1362_v37  ;;  %vm4576_vm13 = vcmp.le.f32.partialorder %v4833_v38, 0.7853982  ;;  %v1365_v8 = vsub.s32 4, %v4536_v26 }
 0x270   : > { %v1466_v57 = vmul.f32 %v1465_v31, %v1463_v9  ;;  %v1260_v50 = vsel %vm1177_vm7, %v1259_v20, %v1258_v42  ;;  %v4836_v46 = vand.u32 2147483647, %v4196_v28  ;;  %v1262_v17 = vsel %vm1177_vm7, %v1261_v23, %v4534_v63 }
 0x271   : > { %v1571_v53 = vxor.u32 2147483648, %v1570_v54  ;;  %v1364_v13 = vsel %vm1281_vm11, %v1363_v18, %v1362_v37  ;;  %v1263_v21 = vsel %vm4567_vm10, %v4191_v40, %v1260_v50  ;;  %v4839_v3 = vand.u32 2147483647, %v4198_v16 }
 0x272   : > { %v1467_v62 = vxor.u32 2147483648, %v1466_v57  ;;  %v1367_v5 = vsel %vm4576_vm13, %v4188_v41, %v1364_v13  ;;  %3372 = vsinq.f32 %v1263_v21  ;;  %vm4591_vm12 = vcmp.le.f32.partialorder %v4836_v46, 0.7853982 }
 0x273   : > { %v1572_v4 = vsel %vm1489_vm8, %v1571_v53, %v1570_v54  ;;  %3374 = vcosq.f32 %v1263_v21  ;;  %vm4605_vm3 = vcmp.le.f32.partialorder %v4839_v3, 0.7853982  ;;  %v1366_v12 = vsel %vm1281_vm11, %v1365_v8, %v4536_v26 }
 0x274   : > { %v1468_v45 = vsel %vm1385_vm9, %v1467_v62, %v1466_v57  ;;  %3376 = vsinq.f32 %v1367_v5  ;;  %v1575_v61 = vsel %vm4591_vm12, %v4196_v28, %v1572_v4  ;;  %v1264_v51 = vsel %vm4567_vm10, 0, %v1262_v17 }
 0x275   : > { %3378 = vcosq.f32 %v1367_v5  ;;  %v1471_v33 = vsel %vm4605_vm3, %v4198_v16, %v1468_v45  ;;  %v1469_v63 = vsub.s32 4, %v4542_v1  ;;  %v1573_v29 = vsub.s32 4, %v4539_v58 }
 0x276   : > { %3380 = vcosq.f32 %v1575_v61  ;;  %v1368_v6 = vsel %vm4576_vm13, 0, %v1366_v12  ;;  %v1268_v48 = vadd.s32 3, %v1264_v51  ;;  %vm1267_vm10 = vweird.f32 %v4191_v40 }
 0x277   : > { %3382 = vsinq.f32 %v1575_v61  ;;  %v1470_v26 = vsel %vm1385_vm9, %v1469_v63, %v4542_v1  ;;  %v1372_v11 = vadd.s32 3, %v1368_v6  ;;  %v1574_v47 = vsel %vm1489_vm8, %v1573_v29, %v4539_v58 }
 0x278   : > { %3384 = vcosq.f32 %v1471_v33  ;;  %v1269_v59 = vand.u32 3, %v1268_v48  ;;  %v1472_v1 = vsel %vm4605_vm3, 0, %v1470_v26  ;;  %v1576_v20 = vsel %vm4591_vm12, 0, %v1574_v47 }
 0x279   : > { %3386 = vsinq.f32 %v1471_v33  ;;  %v1373_v18 = vand.u32 3, %v1372_v11  ;;  %v1476_v53 = vadd.s32 3, %v1472_v1  ;;  %v1580_v21 = vadd.s32 3, %v1576_v20  ;;  %v4846_v20 = vld [vmem:[#allocation8_spill] sm:$0xff] }
 0x27a   : > { %vm1271_vm15 = vcmp.eq.s32.totalorder %v1269_v59, 0  ;;  %vm1274_vm2 = vcmp.eq.s32.totalorder %v1269_v59, 2  ;;  %vm1270_vm0 = vcmp.lt.s32.totalorder %v1269_v59, 2  ;;  %vm1371_vm13 = vweird.f32 %v4188_v41 }
 0x27b   : > { %vm1375_vm4 = vcmp.eq.s32.totalorder %v1373_v18, 0  ;;  %vm1378_vm5 = vcmp.eq.s32.totalorder %v1373_v18, 2  ;;  %v1477_v3 = vand.u32 3, %v1476_v53  ;;  %v1581_v33 = vand.u32 3, %v1580_v21 }
 0x27c   : > { %v3373_v56 = vpop.eup %3372  ;;  %vm1374_vm1 = vcmp.lt.s32.totalorder %v1373_v18, 2  ;;  %vm1475_vm12 = vweird.f32 %v4198_v16  ;;  %vm1579_vm3 = vweird.f32 %v4196_v28  ;;  %v3336_v16 = vld [vmem:[%s4783_s8 + $0x18] sm:$0xff]   ;;  %v3426_v28 = vmov 0.0  }
 0x27d   : > { %v3375_v15 = vpop.eup %3374  ;;  %v1272_v9 = vxor.u32 2147483648, %v3373_v56  ;;  %vm1479_vm14 = vcmp.eq.s32.totalorder %v1477_v3, 0  ;;  %vm1482_vm6 = vcmp.eq.s32.totalorder %v1477_v3, 2  ;;  %vm1583_vm7 = vcmp.eq.s32.totalorder %v1581_v33, 0  ;;  %3148 = vmatprep.subr.bf16.mxu0 %v3426_v28 }
 0x27e   : > { %v3377_v27 = vpop.eup %3376  ;;  %v1275_v31 = vxor.u32 2147483648, %v3375_v15  ;;  %vm1586_vm11 = vcmp.eq.s32.totalorder %v1581_v33, 2  ;;  %vm1478_vm8 = vcmp.lt.s32.totalorder %v1477_v3, 2  ;;  %vm1582_vm9 = vcmp.lt.s32.totalorder %v1581_v33, 2  ;;  %v3338_v33 = vld [vmem:[%s4785_s10 + $0x8] sm:$0xff]  }
 0x27f   : > { %v3379_v37 = vpop.eup %3378  ;;  %v1376_v50 = vxor.u32 2147483648, %v3377_v27  ;;  %v1273_v23 = vsel %vm1271_vm15, %v3375_v15, %v1272_v9  ;;  %vm4842_vm15 = vcmask 523264  }
 0x280   : > { %v1379_v14 = vxor.u32 2147483648, %v3379_v37  ;;  %v1276_v46 = vsel %vm1274_vm2, %v1275_v31, %v3373_v56  ;;  %vm4843_vm2 = vmmov %vm4842_vm15  ;;  %v4847_v31 = vld [vmem:[#allocation6_spill] sm:$0xff] }
 0x281   : > { %v1377_v17 = vsel %vm1375_vm4, %v3379_v37, %v1376_v50  ;;  %v1277_v48 = vsel %vm1270_vm0, %v1273_v23, %v1276_v46  ;;  %vm4844_vm4 = vmmov %vm4843_vm2  ;;  %v4850_v23 = vld [vmem:[#allocation11_spill] sm:$0xff] }
 0x282   : > { %v1380_v36 = vsel %vm1378_vm5, %v1379_v14, %v3377_v27  ;;  %v3335_v27 = vld [vmem:[%s4783_s8 + $0x10] sm:$0xff]   ;;  %vm3427_vm5 = vmmov 0   ;;  %v4848_v14 = vld [vmem:[#allocation12_spill] sm:$0xff]  ;;  %vm4852_vm0 = vmmov %vm4843_vm2 }
 0x283   : > { %3156 = vmatprep.mubr.msk.bf16.mxu0 %vm3427_vm5, %v3426_v28 }
 0x2f4   : > { %v3126_v24 = vpop.f32.mrb[0].mxu1 }
 0x2f5   : > { %v2010_v34 = vadd.f32 %v3126_v24, %v4151_v22  ;;  %v2001_v43 = vpop.f32.mrb[1].mxu1 }
 0x2f6   : > { %v2002_v10 = vadd.f32 %v2001_v43, %v4144_v39  ;;  %v3127_v30 = vpop.f32.mrb[2].mxu1 }
 0x2f7   : > { %v2013_v7 = vadd.f32 %v3127_v30, %v4146_v19  ;;  %v2004_v42 = vpop.f32.mrb[3].mxu1  ;;  %v2034_v2 = vmax.f32 %v2010_v34, 0.0  ;;  %v3381_v19 = vpop.eup %3380  ;;  %v1381_v34 = vsel %vm1374_vm1, %v1377_v17, %v1380_v36  ;;  %v1278_v30 = vsel %vm1267_vm10, nan, %v1277_v48  ;;  %v3337_v36 = vld [vmem:[%s4785_s10] sm:$0xff]   ;;  %vm4853_vm1 = vmmov %vm4852_vm0 }
 0x2f8   : > { %v2005_v22 = vadd.f32 %v2004_v42, %v4142_v52  ;;  %v2032_v54 = vmax.f32 %v2002_v10, 0.0  ;;  %v3383_v52 = vpop.eup %3382  ;;  %v1587_v0 = vxor.u32 2147483648, %v3381_v19  ;;  %v1382_v11 = vsel %vm1371_vm13, nan, %v1381_v34  ;;  %v3334_v42 = vld [vmem:[%s4783_s8 + $0x8] sm:$0xff]   ;;  %v2230_v48 = vpop.permute.xlu0 %2229 }
 0x2f9   : > { %v2035_v39 = vmax.f32 %v2013_v7, 0.0  ;;  %v3385_v62 = vpop.eup %3384  ;;  %v1584_v12 = vxor.u32 2147483648, %v3383_v52  ;;  %v2410_v7 = vpack.c.bf16 %v1382_v11, %v1278_v30 }
 0x2fa   : > { %v2033_v58 = vmax.f32 %v2005_v22, 0.0  ;;  %v3387_v5 = vpop.eup %3386  ;;  %v1483_v29 = vxor.u32 2147483648, %v3385_v62  ;;  %v1588_v10 = vsel %vm1586_vm11, %v1587_v0, %v3383_v52  ;;  %vm4857_vm11 = vcmask 261120  }
 0x2fb   : > { %v2049_v57 = vpack.c.bf16 %v2035_v39, %v2034_v2  ;;  %v1480_v63 = vxor.u32 2147483648, %v3387_v5  ;;  %v1585_v56 = vsel %vm1583_vm7, %v3381_v19, %v1584_v12  ;;  %v4845_v2 = vld [vmem:[#allocation7_spill] sm:$0xff]  ;;  %v3339_v12 = vld [vmem:[%s4785_s10 + $0x10] sm:$0xff]   ;;  %vm4856_vm7 = vmmov %vm4852_vm0 }
 0x2fc   : > { %v2048_v13 = vpack.c.bf16 %v2033_v58, %v2032_v54  ;;  %v3130_v44 = vpop.f32.mrb[4].mxu1  ;;  %v1484_v26 = vsel %vm1482_vm6, %v1483_v29, %v3387_v5  ;;  %v1589_v15 = vsel %vm1582_vm9, %v1585_v56, %v1588_v10  ;;  %vm4855_vm6 = vmmov %vm4852_vm0  ;;  %v3343_v29 = vld [vmem:[%s4788_s13 + $0x8] sm:$0xff]  }
 0x2fd   : > { %v2026_v38 = vadd.f32 %v3130_v44, %v4168_v60  ;;  %v2017_v49 = vpop.f32.mrb[5].mxu1  ;;  %v1590_v41 = vsel %vm1579_vm3, nan, %v1589_v15  ;;  %vm4858_vm10 = vmmov %vm4857_vm11 }
 0x2fe   : > { %v2018_v4 = vadd.f32 %v2017_v49, %v4160_v55  ;;  %v3131_v8 = vpop.f32.mrb[6].mxu1  ;;  %3132 = vmatprep.subr.bf16.mxu1 %v2048_v13  ;;  %vm4859_vm13 = vmmov %vm4858_vm10 }
 0x2ff   : > { %v2029_v45 = vadd.f32 %v3131_v8, %v4165_v35  ;;  %v2020_v61 = vpop.f32.mrb[7].mxu1  ;;  %3133 = vmatpush3.bf16.msra.mxu1 %v2048_v13  ;;  %v2038_v51 = vmax.f32 %v2026_v38, 0.0  ;;  %v4851_v8 = vld [vmem:[#allocation9_spill] sm:$0xff]  ;;  %vm4861_vm9 = vmmov %vm4852_vm0 }
 0x300   : > { %v2021_v60 = vadd.f32 %v2020_v61, %v4156_v25  ;;  %3134 = vmatprep.subr.bf16.mxu1 %v2049_v57  ;;  %v2036_v6 = vmax.f32 %v2018_v4, 0.0  ;;  %v1481_v25 = vsel %vm1479_vm14, %v3385_v62, %v1480_v63  ;;  %vm4854_vm14 = vmmov %vm4852_vm0  ;;  %v3342_v63 = vld [vmem:[%s4788_s13] sm:$0xff]  }
 0x301   : > { %v2039_v55 = vmax.f32 %v2029_v45, 0.0  ;;  %v1485_v47 = vsel %vm1478_vm8, %v1481_v25, %v1484_v26  ;;  %vm4860_vm8 = vmmov %vm4858_vm10  ;;  %v2235_v26 = vpop.permute.xlu1 %2234 }
 0x302   : > { %v2037_v24 = vmax.f32 %v2021_v60, 0.0  ;;  %v1486_v40 = vsel %vm1475_vm12, nan, %v1485_v47  ;;  %vm4862_vm12 = vcmask 1043456  }
 0x303   : > { %v2051_v35 = vpack.c.bf16 %v2039_v55, %v2038_v51  ;;  %3135 = vmatpush3.bf16.msra.mxu1 %v2049_v57  ;;  %v2411_v22 = vpack.c.bf16 %v1590_v41, %v1486_v40  ;;  %v3340_v51 = vld [vmem:[%s4785_s10 + $0x18] sm:$0xff]   ;;  %v3341_v55 = vld [vmem:[%s4785_s10 + $0x20] ss:$0 sps:$4 sm:$0x11]   ;;  %vm4863_vm3 = vmmov %vm4862_vm12 }
 0x304   : > { %v2050_v43 = vpack.c.bf16 %v2037_v24, %v2036_v6  ;;  %v3344_v6 = vld [vmem:[%s4788_s13 + $0x10] sm:$0xff]   ;;  %v3345_v24 = vld [vmem:[%s4788_s13 + $0x18] sm:$0xff]  }
 0x306   : > { %3136 = vmatprep.subr.bf16.mxu1 %v2050_v43 }
 0x307   : > { %3137 = vmatpush3.bf16.msra.mxu1 %v2050_v43 }
 0x308   : > { %3138 = vmatprep.subr.bf16.mxu1 %v2051_v35 }
 0x30b   : > { %3139 = vmatpush3.bf16.msra.mxu1 %v2051_v35  ;;  %v3346_v35 = vld [vmem:[%s4787_s12] sm:$0xff]  }
 0x30c   : > { %3176 = vmatprep.subr.bf16.mxu1 %v2410_v7 }
 0x30e   : > { %3141 = vmatmul.mubr.msk.bf16.vlgmr.msra.gmra.mrb[8].mxu1 %vm4842_vm15, %v3334_v42  ;;  %vm4864_vm15 = vmmov %vm4852_vm0 }
 0x30f   : > { %3177 = vmatpush3.bf16.msra.mxu1 %v2410_v7  ;;  %3144 = vmatprep.mubr.msk.bf16.mxu1 %vm4843_vm2, %v3335_v27  ;;  %v2240_v7 = vpop.permute.xlu0 %2239  ;;  %v2245_v27 = vpop.permute.xlu1 %2244  ;;  %vm4865_vm2 = vmmov %vm4852_vm0 }
 0x310   : > { %3178 = vmatprep.subr.bf16.mxu1 %v2411_v22 }
 0x313   : > { %3179 = vmatpush3.bf16.msra.mxu1 %v2411_v22 }
 0x316   : > { %3145 = vmatmul.mubr.msk.bf16.gmra.mrb[12].mxu1 %vm4844_vm4, %v3336_v16  ;;  %vm2635_vm4 = vcmask 64512  }
 0x317   : > { %3180 = vmatprep.mubr.msk.bf16.mxu1 %vm4857_vm11, %v3342_v63 }
 0x31e   : > { %3181 = vmatmul.mubr.msk.bf16.vlgmr.msra.gmra.mrb[16].mxu1 %vm4858_vm10, %v3343_v29 }
 0x31f   : > { %3184 = vmatprep.mubr.msk.bf16.mxu1 %vm4859_vm13, %v3344_v6 }
 0x326   : > { %3185 = vmatmul.mubr.msk.bf16.gmra.mrb[20].mxu1 %vm4860_vm8, %v3345_v24 }
 0x327   : > { %3196 = vmatprep.mubr.msk.bf16.mxu1 %vm4861_vm9, %v3346_v35 }
 0x3e1   : > { %v3142_v59 = vpop.f32.mrb[8].mxu1 }
 0x3e2   : > { %v2175_v1 = vadd.f32 %v3142_v59, %v4176_v32  ;;  %v2166_v37 = vpop.f32.mrb[9].mxu1  ;;  %v4849_v32 = vld [vmem:[#allocation10_spill] sm:$0xff] }
 0x3e3   : > { %v2167_v39 = vadd.f32 %v2166_v37, %v4845_v2  ;;  %v3143_v9 = vpop.f32.mrb[10].mxu1 }
 0x3e4   : > { %v2178_v54 = vadd.f32 %v3143_v9, %v4846_v20  ;;  %v2169_v58 = vpop.f32.mrb[11].mxu1  ;;  %v2199_v19 = vmax.f32 %v2175_v1, 0.0 }
 0x3e5   : > { %v2170_v18 = vadd.f32 %v2169_v58, %v4847_v31  ;;  %v2197_v50 = vmax.f32 %v2167_v39, 0.0  ;;  %v2250_v39 = vpop.permute.xlu0 %2249  ;;  %v2255_v58 = vpop.permute.xlu1 %2254 }
 0x3e6   : > { %v2200_v57 = vmax.f32 %v2178_v54, 0.0 }
 0x3e7   : > { %v2198_v53 = vmax.f32 %v2170_v18, 0.0 }
 0x3e8   : > { %v2215_v52 = vpack.c.bf16 %v2200_v57, %v2199_v19 }
 0x3e9   : > { %v2214_v13 = vpack.c.bf16 %v2198_v53, %v2197_v50  ;;  %v3146_v44 = vpop.f32.mrb[12].mxu1 }
 0x3ea   : > { %v2191_v21 = vadd.f32 %v3146_v44, %v4848_v14  ;;  %v2182_v62 = vpop.f32.mrb[13].mxu1 }
 0x3eb   : > { %v2183_v38 = vadd.f32 %v2182_v62, %v4849_v32  ;;  %v3147_v49 = vpop.f32.mrb[14].mxu1  ;;  %3149 = vmatpush3.bf16.msra.mxu0 %v2214_v13 }
 0x3ec   : > { %v2194_v5 = vadd.f32 %v3147_v49, %v4850_v23  ;;  %v2185_v4 = vpop.f32.mrb[15].mxu1  ;;  %3150 = vmatprep.subr.bf16.mxu0 %v3426_v28  ;;  %v2203_v0 = vmax.f32 %v2191_v21, 0.0  ;;  %v2265_v21 = vpop.permute.xlu1 %2264  ;;  %v619_v49 = vld [vmem:[%s3692_s26 + $0x10] sm:$0xff] }
 0x3ed   : > { %v2186_v46 = vadd.f32 %v2185_v4, %v4851_v8  ;;  %v2201_v61 = vmax.f32 %v2183_v38, 0.0  ;;  %v2614_v8 = vpack.c.bf16 %v619_v49, %v619_v49 }
 0x3ee   : > { %v2204_v45 = vmax.f32 %v2194_v5, 0.0 }
 0x3ef   : > { %v2202_v17 = vmax.f32 %v2186_v46, 0.0  ;;  %3151 = vmatpush3.bf16.msra.mxu0 %v2215_v52  ;;  %v2260_v52 = vpop.permute.xlu0 %2259 }
 0x3f0   : > { %v2217_v3 = vpack.c.bf16 %v2204_v45, %v2203_v0  ;;  %3152 = vmatprep.subr.bf16.mxu0 %v3426_v28  ;;  %v3347_v0 = vld [vmem:[%s4787_s12 + $0x8] sm:$0xff]   ;;  %v2740_v29 = vpop.permute.xlu1 %2739 }
 0x3f1   : > { %v2216_v60 = vpack.c.bf16 %v2202_v17, %v2201_v61  ;;  %v3348_v61 = vld [vmem:[%s4787_s12 + $0x10] sm:$0xff]  }
 0x3f3   : > { %3153 = vmatpush3.bf16.msra.mxu0 %v2216_v60  ;;  %v2735_v63 = vpop.permute.xlu0 %2734 }
 0x3f4   : > { %3154 = vmatprep.subr.bf16.mxu0 %v3426_v28  ;;  %v2750_v24 = vpop.permute.xlu1 %2749 }
 0x3f7   : > { %3155 = vmatpush3.bf16.msra.mxu0 %v2217_v3  ;;  %v2649_v3 = vsel %vm4863_vm3, %v2614_v8, 0  ;;  %v2745_v6 = vpop.permute.xlu0 %2744 }
 0x3f8   : > { %3214 = vmatprep.subr.bf16.mxu0 %v3426_v28 }
 0x3fa   : > { %3157 = vmatmul.mubr.msk.bf16.vlgmr.msra.gmra.mrb[8].mxu0 %vm4852_vm0, %v3337_v36  ;;  %v3349_v36 = vld [vmem:[%s4787_s12 + $0x18] sm:$0xff]  }
 0x3fb   : > { %3160 = vmatprep.mubr.msk.bf16.mxu0 %vm3427_vm5, %v3426_v28 }
 0x402   : > { %3161 = vmatmul.mubr.msk.bf16.gmra.mrb[12].mxu0 %vm4853_vm1, %v3338_v33  ;;  %v3350_v33 = vld [vmem:[%s4789_s14] sm:$0xff]   ;;  %vm2845_vm1 = vcmask 1042432  }
 0x403   : > { %3164 = vmatprep.mubr.msk.bf16.mxu0 %vm3427_vm5, %v3426_v28 }
 0x40a   : > { %3165 = vmatmul.mubr.msk.bf16.gmra.mrb[16].mxu0 %vm4854_vm14, %v3339_v12  ;;  %v3351_v12 = vld [vmem:[%s4789_s14 + $0x8] sm:$0xff]  }
 0x40b   : > { %3168 = vmatprep.mubr.msk.bf16.mxu0 %vm3427_vm5, %v3426_v28 }
 0x412   : > { %3169 = vmatmul.mubr.msk.bf16.gmra.mrb[20].mxu0 %vm4855_vm6, %v3340_v51  ;;  %v3352_v51 = vld [vmem:[%s4789_s14 + $0x10] sm:$0xff]  }
 0x413   : > { %3172 = vmatprep.mubr.msk.bf16.mxu0 %vm3427_vm5, %v3426_v28 }
 0x41a   : > { %3173 = vmatmul.mubr.msk.bf16.gmra.mrb[24].mxu0 %vm4856_vm7, %v3341_v55  ;;  %v3353_v55 = vld [vmem:[%s4789_s14 + $0x18] sm:$0xff]  }
 0x41b   : > { %3222 = vmatprep.mubr.msk.bf16.mxu0 %vm3427_vm5, %v3426_v28  ;;  %vm4866_vm5 = vmmov %vm4852_vm0 }
 0x4cd   : > { %v2344_v34 = vpop.f32.mrb[8].mxu0 }
 0x4ce   : > { %v2345_v43 = vadd.f32 %v2344_v34, %v2230_v48  ;;  %v3158_v25 = vpop.f32.mrb[9].mxu0 }
 0x4cf   : > { %v2347_v56 = vpop.f32.mrb[10].mxu0 }
 0x4d0   : > { %v2348_v10 = vadd.f32 %v2347_v56, %v2235_v26  ;;  %v3159_v30 = vpop.f32.mrb[11].mxu0  ;;  %v2382_v11 = vmax.f32 %v2345_v43, 0.0  ;;  %v2755_v43 = vpop.permute.xlu0 %2754 }
 0x4d1   : > { %v2760_v30 = vpop.permute.xlu1 %2759 }
 0x4d2   : > { %v2383_v47 = vmax.f32 %v2348_v10, 0.0 }
 0x4d4   : > { %v2398_v15 = vpack.c.bf16 %v2383_v47, %v2382_v11 }
 0x4d5   : > { %v2352_v42 = vpop.f32.mrb[12].mxu0 }
 0x4d6   : > { %v2353_v40 = vadd.f32 %v2352_v42, %v2240_v7  ;;  %v3162_v41 = vpop.f32.mrb[13].mxu0  ;;  %3188 = vmatprep.subr.bf16.mxu1 %v2398_v15 }
 0x4d7   : > { %v2355_v22 = vpop.f32.mrb[14].mxu0  ;;  %3189 = vmatpush3.bf16.msra.mxu1 %v2398_v15  ;;  %v2765_v41 = vpop.permute.xlu0 %2764 }
 0x4d8   : > { %v2356_v16 = vadd.f32 %v2355_v22, %v2245_v27  ;;  %v3163_v59 = vpop.f32.mrb[15].mxu0  ;;  %v2384_v1 = vmax.f32 %v2353_v40, 0.0 }
 0x4da   : > { %v2385_v37 = vmax.f32 %v2356_v16, 0.0 }
 0x4dc   : > { %v2399_v2 = vpack.c.bf16 %v2385_v37, %v2384_v1  ;;  %v2770_v1 = vpop.permute.xlu1 %2769 }
 0x4dd   : > { %v2360_v9 = vpop.f32.mrb[16].mxu0 }
 0x4de   : > { %v2361_v20 = vadd.f32 %v2360_v9, %v2250_v39  ;;  %v3166_v54 = vpop.f32.mrb[17].mxu0  ;;  %3190 = vmatprep.subr.bf16.mxu1 %v2399_v2 }
 0x4df   : > { %v2363_v31 = vpop.f32.mrb[18].mxu0  ;;  %3191 = vmatpush3.bf16.msra.mxu1 %v2399_v2 }
 0x4e0   : > { %v2364_v18 = vadd.f32 %v2363_v31, %v2255_v58  ;;  %v3167_v19 = vpop.f32.mrb[19].mxu0  ;;  %v2386_v57 = vmax.f32 %v2361_v20, 0.0 }
 0x4e2   : > { %v2387_v50 = vmax.f32 %v2364_v18, 0.0 }
 0x4e4   : > { %v2400_v53 = vpack.c.bf16 %v2387_v50, %v2386_v57  ;;  %v2788_v50 = vld [vmem:[%s4791_s16] sm:$0x3] }
 0x4e5   : > { %v2368_v13 = vpop.f32.mrb[20].mxu0 }
 0x4e6   : > { %v2369_v44 = vadd.f32 %v2368_v13, %v2260_v52  ;;  %v3170_v14 = vpop.f32.mrb[21].mxu0  ;;  %3192 = vmatprep.subr.bf16.mxu1 %v2400_v53  ;;  %v2797_v13 = vpop.permute.xlu1 %2796 }
 0x4e7   : > { %v2371_v62 = vpop.f32.mrb[22].mxu0  ;;  %3193 = vmatpush3.bf16.msra.mxu1 %v2400_v53  ;;  %v2270_v53 = vpop.permute.xlu0 %2269 }
 0x4e8   : > { %v2372_v32 = vadd.f32 %v2371_v62, %v2265_v21  ;;  %v3171_v38 = vpop.f32.mrb[23].mxu0  ;;  %v2388_v23 = vmax.f32 %v2369_v44, 0.0 }
 0x4ea   : > { %v2389_v5 = vmax.f32 %v2372_v32, 0.0 }
 0x4ec   : > { %v2401_v4 = vpack.c.bf16 %v2389_v5, %v2388_v23 }
 0x4ed   : > { %v4721_v46 = vpop.f32.mrb[24].mxu0 }
 0x4ee   : > { %3194 = vmatprep.subr.bf16.mxu1 %v2401_v4  ;;  %v3174_v45 = vpop.f32.mrb[25].mxu0  ;;  %v2377_v52 = vadd.f32 %v4721_v46, %v2270_v53 }
 0x4ef   : > { %3195 = vmatpush3.bf16.msra.mxu1 %v2401_v4  ;;  %v2379_v17 = vpop.f32.mrb[26].mxu0 }
 0x4f0   : > { %3251 = vmatprep.subr.msk.bf16.mxu1 %vm4862_vm12, %v2614_v8  ;;  %v3175_v60 = vpop.f32.mrb[27].mxu0  ;;  %v2843_v14 = vrot.slane %v2377_v52, 5 }
 0x4f2   : > { %3197 = vmatmul.mubr.msk.bf16.vlgmr.msra.gmra.mrb[16].mxu1 %vm4864_vm15, %v3347_v0 }
 0x4f3   : > { %3200 = vmatprep.mubr.msk.bf16.mxu1 %vm4865_vm2, %v3348_v61  ;;  %3205 = vmatpush3.bf16.msra.mxu1 %v2649_v3  ;;  %v4869_v3 = vld [vmem:[#allocation5_spill] sm:$0xff] }
 0x4f4   : > { %vm2862_vm6 = vcmp.lt.s32.totalorder %v4869_v3, 3 }
 0x4fa   : > { %3201 = vmatmul.mubr.msk.bf16.gmra.mrb[20].mxu1 %vm4866_vm5, %v3349_v36 }
 0x4fb   : > { %3206 = vmatprep.mubr.msk.bf16.mxu1 %vm2635_vm4, %v3350_v33 }
 0x502   : > { %3207 = vmatmul.mubr.msk.bf16.vlgmr.msra.gmra.mrb[16].mxu1 %vm2635_vm4, %v3351_v12 }
 0x503   : > { %3210 = vmatprep.mubr.msk.bf16.mxu1 %vm2635_vm4, %v3352_v51 }
 0x50a   : > { %3211 = vmatmul.mubr.msk.bf16.gmra.mrb[20].mxu1 %vm2635_vm4, %v3353_v55 }
 0x5d5   : > { %v3208_v35 = vpop.f32.mrb[16].mxu1 }
 0x5d6   : > { %v2774_v48 = vadd.f32 %v3208_v35, %v2745_v6  ;;  %v2685_v34 = vpop.f32.mrb[17].mxu1 }
 0x5d7   : > { %v2772_v25 = vadd.f32 %v2735_v63, %v2685_v34  ;;  %v3209_v26 = vpop.f32.mrb[18].mxu1 }
 0x5d8   : > { %v2775_v56 = vadd.f32 %v3209_v26, %v2750_v24  ;;  %v2688_v10 = vpop.f32.mrb[19].mxu1  ;;  %v2782_v47 = vmax.f32 %v2774_v48, 0.0 }
 0x5d9   : > { %v2773_v11 = vadd.f32 %v2740_v29, %v2688_v10  ;;  %v2780_v7 = vmax.f32 %v2772_v25, 0.0 }
 0x5da   : > { %v2783_v15 = vmax.f32 %v2775_v56, 0.0 }
 0x5db   : > { %v2781_v42 = vmax.f32 %v2773_v11, 0.0 }
 0x5dc   : > { %v2790_v40 = vpack.c.bf16 %v2783_v15, %v2782_v47 }
 0x5dd   : > { %v2789_v27 = vpack.c.bf16 %v2781_v42, %v2780_v7  ;;  %v3212_v22 = vpop.f32.mrb[20].mxu1 }
 0x5de   : > { %v2778_v16 = vadd.f32 %v3212_v22, %v2765_v41  ;;  %v2701_v59 = vpop.f32.mrb[21].mxu1 }
 0x5df   : > { %v2776_v37 = vadd.f32 %v2755_v43, %v2701_v59  ;;  %v3213_v2 = vpop.f32.mrb[22].mxu1  ;;  %3215 = vmatpush3.bf16.msra.mxu0 %v2789_v27 }
 0x5e0   : > { %v2779_v39 = vadd.f32 %v3213_v2, %v2770_v1  ;;  %v2704_v9 = vpop.f32.mrb[23].mxu1  ;;  %3216 = vmatprep.subr.bf16.mxu0 %v3426_v28  ;;  %v2786_v54 = vmax.f32 %v2778_v16, 0.0 }
 0x5e1   : > { %v2777_v20 = vadd.f32 %v2760_v30, %v2704_v9  ;;  %v2784_v31 = vmax.f32 %v2776_v37, 0.0 }
 0x5e2   : > { %v2787_v58 = vmax.f32 %v2779_v39, 0.0 }
 0x5e3   : > { %v2785_v18 = vmax.f32 %v2777_v20, 0.0  ;;  %3217 = vmatpush3.bf16.msra.mxu0 %v2790_v40 }
 0x5e4   : > { %v2792_v19 = vpack.c.bf16 %v2787_v58, %v2786_v54  ;;  %3218 = vmatprep.subr.bf16.mxu0 %v3426_v28 }
 0x5e5   : > { %v2791_v57 = vpack.c.bf16 %v2785_v18, %v2784_v31 }
 0x5e7   : > { %3219 = vmatpush3.bf16.msra.mxu0 %v2791_v57 }
 0x5e8   : > { %3220 = vmatprep.subr.bf16.mxu0 %v3426_v28 }
 0x5eb   : > { %3221 = vmatpush3.bf16.msra.mxu0 %v2792_v19 }
 0x5ee   : > { %3223 = vmatmul.mubr.msk.bf16.vlgmr.msra.gmra.mrb[28].mxu0 %vm4852_vm0, %v2788_v50 }
 0x6c1   : > { %v2836_v44 = vpop.f32.mrb[28].mxu0 }
 0x6c2   : > { %v2837_v21 = vadd.f32 %v2836_v44, %v2797_v13  ;;  %v3224_v62 = vpop.f32.mrb[29].mxu0 }
 0x6c3   : > { %v2839_v32 = vpop.f32.mrb[30].mxu0 }
 0x6c4   : > { %v2846_v28 = vsel %vm2845_vm1, %v2837_v21, %v2843_v14  ;;  %v3225_v38 = vpop.f32.mrb[31].mxu0 }
 0x6c5   : > { %v2847_v49 = vand.u32 2147483647, %v2846_v28  ;;  %vm2851_vm14 = vcmp.ge.f32.partialorder %v2846_v28, 0.0  ;;  %v2856_v45 = vmax.f32 %v2846_v28, 0.0 }
 0x6c7   : > { %v2848_v23 = vsub.f32 0.0, %v2847_v49 }
 0x6c9   : > { %v2849_v5 = vmul.f32 1.442695, %v2848_v23 }
 0x6cb   : > { %3388 = vpow2.f32 %v2849_v5 }
 0x6d5   : > { %v3389_v4 = vpop.eup %3388 }
 0x6d6   : > { %v2853_v8 = vadd.f32 1.0, %v3389_v4  ;;  %v2852_v17 = vsel %vm2851_vm14, 1.0, %v3389_v4 }
 0x6d8   : > { %3390 = vrcp.f32 %v2853_v8 }
 0x6d9   : > { %3392 = vlog2.f32 %v2853_v8 }
 0x6e2   : > { %v3391_v46 = vpop.eup %3390 }
 0x6e3   : > { %v3393_v0 = vpop.eup %3392  ;;  %v2855_v60 = vmul.f32 %v3391_v46, %v2852_v17 }
 0x6e4   : > { %v2858_v61 = vmul.f32 0.6931472, %v3393_v0 }
 0x6e6   : > { %v2859_v36 = vadd.f32 %v2858_v61, %v2856_v45 }
 0x6e8   : > { %v2865_v33 = vsel %vm2862_vm6, %v2855_v60, %v2859_v36 }
 0x6e9   : > { %2866 = vst [vmem:[%s615_s21] sm:$0xf] %v2865_v33 }
 0x6ea PF: > { %s4870_s27 = sld [smem:[#allocation3_spill]]  ;;  %s4871_s28 = sld [smem:[#allocation4_spill]] }
 0x6eb   : > { %p25_p9 = scmp.ge.s32.totalorder %s3540_s0, 4   ;;  %s4872_s29 = smov %s3540_s0 }
 0x6ed   :  { %27 = sbr.rel (!%p25_p9) target bundleno = 6 (0x6), region = 165 }

</bundles_post_ra>
